<compile_context>
chip_gen: v7x
topology: tpu7x:2x2x1
jax: 0.10.0
libtpu: 0.0.40
codegen_flags: <defaults>
</compile_context>

<pallas_src>
import random

import jax
import jax.numpy as jnp
from jax.experimental import pallas as pl
from jax.experimental.pallas import tpu as pltpu


_TN = 256   # output channels per grid step (512 = 2 steps x 256)


# ---------------------------------------------------------------------------
# Kernel: one lane-dense MXU GEMM per grid step.
# ---------------------------------------------------------------------------
def _gemm_kernel(xt_ref, w_ref, o_ref):
    """
    xt_ref : (49, 2304)  bf16  im2col taps of the (double-)rolled input;
                               rows = spatial (o*7+p), cols = (k, j, c)
    w_ref  : (2304, 256) bf16  folded w1*w2 weight tile; cols = output chan i
    o_ref  : (49, 256)   f32   output tile, lanes = output channels (dense)
    """
    o_ref[...] = jnp.dot(xt_ref[...], w_ref[...],
                         preferred_element_type=jnp.float32)


def _fused(xt, weff):
    s, kdim = xt.shape            # (49, 2304)
    n_out = weff.shape[1]         # 512
    grid = (n_out // _TN,)        # (2,)
    return pl.pallas_call(
        _gemm_kernel,
        out_shape=jax.ShapeDtypeStruct((s, n_out), jnp.float32),
        grid_spec=pltpu.PrefetchScalarGridSpec(
            num_scalar_prefetch=0,
            grid=grid,
            in_specs=[
                pl.BlockSpec((s, kdim), lambda i: (0, 0)),
                pl.BlockSpec((kdim, _TN), lambda i: (0, i)),
            ],
            out_specs=pl.BlockSpec((s, _TN), lambda i: (0, i)),
        ),
        compiler_params=pltpu.CompilerParams(
            dimension_semantics=("parallel",)),
    )(xt, weff)


# ---------------------------------------------------------------------------
# One-time weight preparation: fold block-diagonal w2 into w1 (f32 -> bf16).
# ---------------------------------------------------------------------------
def prepare_params(w1, w2):
    """
    w1: (512, 32, 3, 3, 8)  [i, l, k, j, m]
    w2: (256, 3, 8)         [c=l*8+b, k, m]
    Returns Weff (2304, 512) bf16 with
        Weff[(k, j, l, b), i] = sum_m w1[i, l, k, j, m] * w2[l*8+b, k, m]
    The K ordering (k, j, c=l*8+b) matches the im2col taps built in forward().
    """
    w2r = w2.reshape(32, 8, 3, 8)                           # (l, b, k, m)
    weff = jnp.einsum('ilkjm,lbkm->kjlbi', w1, w2r,
                      precision=jax.lax.Precision.HIGHEST)  # (3,3,32,8,512) f32
    return weff.reshape(9 * 256, 512).astype(jnp.bfloat16)


# ---------------------------------------------------------------------------
# Forward pass: tiny XLA prep on the 50 KB input + ONE fused GEMM kernel.
# ---------------------------------------------------------------------------
def forward(x, weff, shift):
    """x: (1, 256, 7, 7) f32; weff from prepare_params(); shift: +/-1 (static)."""
    # Fold BOTH torch.roll calls into the input (the second roll commutes with
    # the per-pixel w2 contraction) and build the 3x3 zero-padded im2col taps,
    # laid out as (spatial=49, K=2304) so the kernel is one lane-dense GEMM.
    # <0.25 MB of XLA glue on a 50 KB input.
    # TODO(synk): the tap build could move in-kernel via pltpu.roll + lane
    #             masks; kept in XLA for lowering robustness.
    x2 = jnp.roll(x.reshape(256, 7, 7), (shift, shift), axis=(1, 2))
    xpad = jnp.pad(x2, ((0, 0), (1, 1), (1, 1)))                  # (256, 9, 9)
    taps = [xpad[:, k:k + 7, j:j + 7] for k in range(3) for j in range(3)]
    xt = jnp.stack(taps, axis=0).reshape(9, 256, 49)              # (t, c, op)
    xtT = xt.transpose(2, 0, 1).reshape(49, 9 * 256)              # (op, t*256+c)
    xtT = xtT.astype(jnp.bfloat16)

    y = _fused(xtT, weff)                                         # (49, 512) f32
    return y.T.reshape(1, 512, 7, 7)


# ---------------------------------------------------------------------------
# Pure-JAX f32 reference (direct transcription of the PyTorch graph).
# ---------------------------------------------------------------------------
def reference(x, w1, w2, shift):
    t3 = jnp.roll(x, shift, axis=2).reshape(1, 256, 7, 7)
    t3p = jnp.pad(t3, ((0, 0), (0, 0), (1, 1), (0, 0)))
    t3u = jnp.stack([t3p[:, :, k:k + 7, :] for k in range(3)], axis=2)
    t4 = jnp.einsum('ljkmn,jki->ljkmni', t3u, w2)
    t5 = t4.reshape(1, 32, 8, 3, 7, 7, 8).sum(axis=2)
    t6 = jnp.roll(t5, shift, axis=4).reshape(1, 672, 7, 8)
    t6p = jnp.pad(t6, ((0, 0), (0, 0), (1, 1), (0, 0)))
    t6u = jnp.stack([t6p[:, :, j:j + 7, :] for j in range(3)], axis=2)
    t6u = t6u.reshape(1, 32, 3, 7, 3, 7, 8)
    return jnp.einsum('nlkojpm,ilkjm->niop', t6u, w1,
                      precision=jax.lax.Precision.HIGHEST)


if __name__ == "__main__":
    # deterministic "random" shift direction, same formula as the module
    random.seed(0)
    shift = int((random.random() > 0.5) * 2 - 1)          # +1 or -1

    key = jax.random.PRNGKey(0)
    k1, k2, k3 = jax.random.split(key, 3)
    x = jax.random.normal(k1, (1, 256, 7, 7), jnp.float32)
    w1 = jax.random.normal(k2, (512, 32, 3, 3, 8), jnp.float32)
    w2 = jax.random.normal(k3, (256, 3, 8), jnp.float32)

    weff = prepare_params(w1, w2)             # one-time weight folding
    fwd = jax.jit(forward, static_argnums=2)

    y = jax.block_until_ready(fwd(x, weff, shift))
    assert y.shape == (1, 512, 7, 7)

    ref = reference(x, w1, w2, shift)
    rel_err = float(jnp.max(jnp.abs(y - ref)) / (jnp.max(jnp.abs(ref)) + 1e-6))
    assert rel_err < 5e-2, f"relative error too large: {rel_err}"

    print("KERNEL_OK")
</pallas_src>

<mosaic_0001>
module attributes {stable_mosaic.version = 11 : i64} {
  func.func @_gemm_kernel(%arg0: i32, %arg1: memref<49x2304xbf16, #tpu.memory_space<vmem>>, %arg2: memref<2304x256xbf16, #tpu.memory_space<vmem>>, %arg3: memref<49x256xf32, #tpu.memory_space<vmem>>) attributes {dimension_semantics = [#tpu.dimension_semantics<parallel>], iteration_bounds = array<i64: 2>, scalar_prefetch = 0 : i64, scratch_operands = 0 : i64, tpu.core_type = #tpu.core_type<tc>, window_params = [{pipeline_mode = #tpu.pipeline_mode<synchronous>, transform_indices = @transform_0, window_bounds = array<i64: 49, 2304>}, {transform_indices = @transform_1, window_bounds = array<i64: 2304, 256>}, {transform_indices = @transform_2, window_bounds = array<i64: 49, 256>}]} {
    %c0 = arith.constant 0 : index
    %c0_0 = arith.constant 0 : index
    %0 = vector.load %arg1[%c0, %c0_0] : memref<49x2304xbf16, #tpu.memory_space<vmem>>, vector<49x2304xbf16>
    %c0_1 = arith.constant 0 : index
    %c0_2 = arith.constant 0 : index
    %1 = vector.load %arg2[%c0_1, %c0_2] : memref<2304x256xbf16, #tpu.memory_space<vmem>>, vector<2304x256xbf16>
    %cst = arith.constant dense<0.000000e+00> : vector<49x256xf32>
    %2 = tpu.matmul %0, %1, %cst {dimension_numbers = #tpu.dot_dimension_numbers<[1], [0], [0], [1], [0, 0, 1, 1], [], []>} : vector<49x2304xbf16>, vector<2304x256xbf16>, vector<49x256xf32> -> vector<49x256xf32>
    %c0_3 = arith.constant 0 : index
    %c0_4 = arith.constant 0 : index
    %3 = vector.load %arg3[%c0_3, %c0_4] : memref<49x256xf32, #tpu.memory_space<vmem>>, vector<49x256xf32>
    tpu.vector_store %arg3[%c0_3, %c0_4], %2 {strides = array<i32>} : memref<49x256xf32, #tpu.memory_space<vmem>>, vector<49x256xf32>,
    return
  }
  func.func @transform_0(%arg0: i32) -> (i32, i32) {
    %c0_i32 = arith.constant 0 : i32
    %c0_i32_0 = arith.constant 0 : i32
    %c0_i32_1 = arith.constant 0 : i32
    return %c0_i32, %c0_i32_0 : i32, i32
  }
  func.func @transform_1(%arg0: i32) -> (i32, i32) {
    %c0_i32 = arith.constant 0 : i32
    %c0_i32_0 = arith.constant 0 : i32
    return %c0_i32, %arg0 : i32, i32
  }
  func.func @transform_2(%arg0: i32) -> (i32, i32) {
    %c0_i32 = arith.constant 0 : i32
    %c0_i32_0 = arith.constant 0 : i32
    return %c0_i32, %arg0 : i32, i32
  }
}

</mosaic_0001>

<bundles_post_ra>
// kernel: forward.1
= control target key start
LH: loop header
LB: loop body
LE: loop exit
PB: predicated region body
PF: predicated region fallthrough
CT: control target
= control target key end

     0   :  { %s5335_s9 = smov 0   ;;  %s5337_s10 = smov 0   ;;  %s6491_s0 = inlined_call_operand.vmem [shape: bf16[49,2304], index: 0, kind: input, shape index: {}]   ;;  %s6492_s1 = inlined_call_operand.vmem [shape: bf16[2304,512], index: 1, kind: input, shape index: {}]   ;;  %s6493_s2 = inlined_call_operand.vmem [shape: f32[49,512], index: 2, kind: output, shape index: {}]  }
   0x1   :  { %s5339_s11 = smov 0  }
   0x2 LB: > { %s4209_s12 = sadd.s32 4294967295, %s5318_s11   ;;  %s5352_s13 = sadd.s32 1, %s5318_s11   ;;  %s5318_s11 = sphi %s5339_s11, %s6497_s11   ;;  %s5314_s10 = sphi %s5337_s10, %s6496_s10   ;;  %s5310_s9 = sphi %s5335_s9, %s6495_s9  }
   0x3   : > { %s37_s14 = ssub.s32 %s5318_s11, %s5352_s13  ;;  %s40_s15 = sadd.s32 1, %s5314_s10 }
   0x4   : > { %p38_p0 = scmp.eq.s32.totalorder %s37_s14, 0  ;;  %p47_p1 = scmp.ne.s32.totalorder %s5314_s10, %s5310_s9 }
   0x5   : > { %p48_p2 = scmp.eq.s32.totalorder %s5318_s11, 0  ;;  %p77_p3 = scmp.eq.s32.totalorder %s4209_s12, 1 }
   0x6   : > { %s5363_s16 = scalar_select %p38_p0, %s5314_s10, %s40_s15  }
   0x7   : > { %p49_p4 = por %p48_p2, %p47_p1  ;;  %p5365_p5 = por %p77_p3, %p47_p1 }
   0x8   : > { %p4212_p6 = scmp.ge.s32.totalorder %s5318_s11, 2 }
   0xa   : > { %102 = sbr.rel (%p4212_p6) target bundleno = 165 (0xa5), region = 20 }
  0x11   : > { %105 = sbr.rel (!%p49_p4) target bundleno = 165 (0xa5), region = 24  ;;  %s107_s18 = sand.u32 (%p49_p4), 1, %s5314_s10  }
  0x12   : > { %s4580_s19 = sshll.u32 (%p49_p4), %s5318_s11, 3  ;;  %s4738_s20 = smul.u32 (%p49_p4), 2304, %s107_s18 }
  0x13   : > { %s5375_s23 = scalar_lea.vmem (%p49_p4), %s6492_s1, %s4580_s19 }
  0x14   : > { %v714_v0 = vld [vmem:[%s5375_s23] sm:$0xff] (%p49_p4)  ;;  %v716_v1 = vld [vmem:[%s5375_s23 + $0x10] sm:$0xff] (%p49_p4)  ;;  %s5383_s24 = scalar_lea.vmem (%p49_p4), [#allocation2], %s4738_s20 }
  0x15   : > { %v718_v2 = vld [vmem:[%s5375_s23 + $0x20] sm:$0xff] (%p49_p4)  ;;  %v720_v3 = vld [vmem:[%s5375_s23 + $0x30] sm:$0xff] (%p49_p4)  ;;  %715 = vst [vmem:[%s5383_s24] sm:$0xff] (%p49_p4), %v714_v0  ;;  %717 = vst [vmem:[%s5383_s24 + $0x8] sm:$0xff] (%p49_p4), %v716_v1 }
  0x16   : > { %v722_v4 = vld [vmem:[%s5375_s23 + $0x40] sm:$0xff] (%p49_p4)  ;;  %v724_v5 = vld [vmem:[%s5375_s23 + $0x50] sm:$0xff] (%p49_p4)  ;;  %719 = vst [vmem:[%s5383_s24 + $0x10] sm:$0xff] (%p49_p4), %v718_v2  ;;  %721 = vst [vmem:[%s5383_s24 + $0x18] sm:$0xff] (%p49_p4), %v720_v3 }
  0x17   : > { %723 = vst [vmem:[%s5383_s24 + $0x20] sm:$0xff] (%p49_p4), %v722_v4  ;;  %725 = vst [vmem:[%s5383_s24 + $0x28] sm:$0xff] (%p49_p4), %v724_v5  ;;  %v726_v6 = vld [vmem:[%s5375_s23 + $0x60] sm:$0xff] (%p49_p4)  ;;  %v728_v7 = vld [vmem:[%s5375_s23 + $0x70] sm:$0xff] (%p49_p4) }
  0x18   : > { %v730_v8 = vld [vmem:[%s5375_s23 + $0x80] sm:$0xff]  ;;  %727 = vst [vmem:[%s5383_s24 + $0x30] sm:$0xff] %v726_v6  ;;  %729 = vst [vmem:[%s5383_s24 + $0x38] sm:$0xff] %v728_v7  ;;  %v732_v9 = vld [vmem:[%s5375_s23 + $0x90] sm:$0xff] }
  0x19   : > { %731 = vst [vmem:[%s5383_s24 + $0x40] sm:$0xff] %v730_v8  ;;  %v734_v10 = vld [vmem:[%s5375_s23 + $0xa0] sm:$0xff]  ;;  %v736_v11 = vld [vmem:[%s5375_s23 + $0xb0] sm:$0xff]  ;;  %733 = vst [vmem:[%s5383_s24 + $0x48] sm:$0xff] %v732_v9 }
  0x1a   : > { %735 = vst [vmem:[%s5383_s24 + $0x50] sm:$0xff] %v734_v10  ;;  %737 = vst [vmem:[%s5383_s24 + $0x58] sm:$0xff] %v736_v11  ;;  %v738_v12 = vld [vmem:[%s5375_s23 + $0xc0] sm:$0xff]  ;;  %v740_v13 = vld [vmem:[%s5375_s23 + $0xd0] sm:$0xff] }
  0x1b   : > { %v742_v14 = vld [vmem:[%s5375_s23 + $0xe0] sm:$0xff]  ;;  %739 = vst [vmem:[%s5383_s24 + $0x60] sm:$0xff] %v738_v12  ;;  %741 = vst [vmem:[%s5383_s24 + $0x68] sm:$0xff] %v740_v13  ;;  %v744_v15 = vld [vmem:[%s5375_s23 + $0xf0] sm:$0xff] }
  0x1c   : > { %743 = vst [vmem:[%s5383_s24 + $0x70] sm:$0xff] %v742_v14  ;;  %v746_v16 = vld [vmem:[%s5375_s23 + $0x100] sm:$0xff]  ;;  %v748_v17 = vld [vmem:[%s5375_s23 + $0x110] sm:$0xff]  ;;  %745 = vst [vmem:[%s5383_s24 + $0x78] sm:$0xff] %v744_v15 }
  0x1d   : > { %747 = vst [vmem:[%s5383_s24 + $0x80] sm:$0xff] %v746_v16  ;;  %749 = vst [vmem:[%s5383_s24 + $0x88] sm:$0xff] %v748_v17  ;;  %v750_v18 = vld [vmem:[%s5375_s23 + $0x120] sm:$0xff]  ;;  %v752_v19 = vld [vmem:[%s5375_s23 + $0x130] sm:$0xff] }
  0x1e   : > { %v754_v20 = vld [vmem:[%s5375_s23 + $0x140] sm:$0xff]  ;;  %751 = vst [vmem:[%s5383_s24 + $0x90] sm:$0xff] %v750_v18  ;;  %753 = vst [vmem:[%s5383_s24 + $0x98] sm:$0xff] %v752_v19  ;;  %v756_v21 = vld [vmem:[%s5375_s23 + $0x150] sm:$0xff] }
  0x1f   : > { %755 = vst [vmem:[%s5383_s24 + $0xa0] sm:$0xff] %v754_v20  ;;  %v758_v22 = vld [vmem:[%s5375_s23 + $0x160] sm:$0xff]  ;;  %v760_v23 = vld [vmem:[%s5375_s23 + $0x170] sm:$0xff]  ;;  %757 = vst [vmem:[%s5383_s24 + $0xa8] sm:$0xff] %v756_v21 }
  0x20   : > { %759 = vst [vmem:[%s5383_s24 + $0xb0] sm:$0xff] %v758_v22  ;;  %761 = vst [vmem:[%s5383_s24 + $0xb8] sm:$0xff] %v760_v23  ;;  %v762_v24 = vld [vmem:[%s5375_s23 + $0x180] sm:$0xff]  ;;  %v764_v25 = vld [vmem:[%s5375_s23 + $0x190] sm:$0xff] }
  0x21   : > { %v766_v26 = vld [vmem:[%s5375_s23 + $0x1a0] sm:$0xff]  ;;  %763 = vst [vmem:[%s5383_s24 + $0xc0] sm:$0xff] %v762_v24  ;;  %765 = vst [vmem:[%s5383_s24 + $0xc8] sm:$0xff] %v764_v25  ;;  %v768_v27 = vld [vmem:[%s5375_s23 + $0x1b0] sm:$0xff] }
  0x22   : > { %767 = vst [vmem:[%s5383_s24 + $0xd0] sm:$0xff] %v766_v26  ;;  %v770_v28 = vld [vmem:[%s5375_s23 + $0x1c0] sm:$0xff]  ;;  %v772_v29 = vld [vmem:[%s5375_s23 + $0x1d0] sm:$0xff]  ;;  %769 = vst [vmem:[%s5383_s24 + $0xd8] sm:$0xff] %v768_v27 }
  0x23   : > { %771 = vst [vmem:[%s5383_s24 + $0xe0] sm:$0xff] %v770_v28  ;;  %773 = vst [vmem:[%s5383_s24 + $0xe8] sm:$0xff] %v772_v29  ;;  %v774_v30 = vld [vmem:[%s5375_s23 + $0x1e0] sm:$0xff]  ;;  %v776_v31 = vld [vmem:[%s5375_s23 + $0x1f0] sm:$0xff] }
  0x24   : > { %v778_v32 = vld [vmem:[%s5375_s23 + $0x200] sm:$0xff]  ;;  %775 = vst [vmem:[%s5383_s24 + $0xf0] sm:$0xff] %v774_v30  ;;  %777 = vst [vmem:[%s5383_s24 + $0xf8] sm:$0xff] %v776_v31  ;;  %v780_v33 = vld [vmem:[%s5375_s23 + $0x210] sm:$0xff] }
  0x25   : > { %779 = vst [vmem:[%s5383_s24 + $0x100] sm:$0xff] %v778_v32  ;;  %v782_v34 = vld [vmem:[%s5375_s23 + $0x220] sm:$0xff]  ;;  %v784_v35 = vld [vmem:[%s5375_s23 + $0x230] sm:$0xff]  ;;  %781 = vst [vmem:[%s5383_s24 + $0x108] sm:$0xff] %v780_v33 }
  0x26   : > { %783 = vst [vmem:[%s5383_s24 + $0x110] sm:$0xff] %v782_v34  ;;  %785 = vst [vmem:[%s5383_s24 + $0x118] sm:$0xff] %v784_v35  ;;  %v786_v36 = vld [vmem:[%s5375_s23 + $0x240] sm:$0xff]  ;;  %v788_v37 = vld [vmem:[%s5375_s23 + $0x250] sm:$0xff] }
  0x27   : > { %v790_v38 = vld [vmem:[%s5375_s23 + $0x260] sm:$0xff]  ;;  %787 = vst [vmem:[%s5383_s24 + $0x120] sm:$0xff] %v786_v36  ;;  %789 = vst [vmem:[%s5383_s24 + $0x128] sm:$0xff] %v788_v37  ;;  %v792_v39 = vld [vmem:[%s5375_s23 + $0x270] sm:$0xff] }
  0x28   : > { %791 = vst [vmem:[%s5383_s24 + $0x130] sm:$0xff] %v790_v38  ;;  %v794_v40 = vld [vmem:[%s5375_s23 + $0x280] sm:$0xff]  ;;  %v796_v41 = vld [vmem:[%s5375_s23 + $0x290] sm:$0xff]  ;;  %793 = vst [vmem:[%s5383_s24 + $0x138] sm:$0xff] %v792_v39 }
  0x29   : > { %795 = vst [vmem:[%s5383_s24 + $0x140] sm:$0xff] %v794_v40  ;;  %797 = vst [vmem:[%s5383_s24 + $0x148] sm:$0xff] %v796_v41  ;;  %v798_v42 = vld [vmem:[%s5375_s23 + $0x2a0] sm:$0xff]  ;;  %v800_v43 = vld [vmem:[%s5375_s23 + $0x2b0] sm:$0xff] }
  0x2a   : > { %v802_v44 = vld [vmem:[%s5375_s23 + $0x2c0] sm:$0xff]  ;;  %799 = vst [vmem:[%s5383_s24 + $0x150] sm:$0xff] %v798_v42  ;;  %801 = vst [vmem:[%s5383_s24 + $0x158] sm:$0xff] %v800_v43  ;;  %v804_v45 = vld [vmem:[%s5375_s23 + $0x2d0] sm:$0xff] }
  0x2b   : > { %803 = vst [vmem:[%s5383_s24 + $0x160] sm:$0xff] %v802_v44  ;;  %v806_v46 = vld [vmem:[%s5375_s23 + $0x2e0] sm:$0xff]  ;;  %v808_v47 = vld [vmem:[%s5375_s23 + $0x2f0] sm:$0xff]  ;;  %805 = vst [vmem:[%s5383_s24 + $0x168] sm:$0xff] %v804_v45 }
  0x2c   : > { %807 = vst [vmem:[%s5383_s24 + $0x170] sm:$0xff] %v806_v46  ;;  %809 = vst [vmem:[%s5383_s24 + $0x178] sm:$0xff] %v808_v47  ;;  %v810_v48 = vld [vmem:[%s5375_s23 + $0x300] sm:$0xff]  ;;  %v812_v49 = vld [vmem:[%s5375_s23 + $0x310] sm:$0xff] }
  0x2d   : > { %v814_v50 = vld [vmem:[%s5375_s23 + $0x320] sm:$0xff]  ;;  %811 = vst [vmem:[%s5383_s24 + $0x180] sm:$0xff] %v810_v48  ;;  %813 = vst [vmem:[%s5383_s24 + $0x188] sm:$0xff] %v812_v49  ;;  %v816_v51 = vld [vmem:[%s5375_s23 + $0x330] sm:$0xff] }
  0x2e   : > { %815 = vst [vmem:[%s5383_s24 + $0x190] sm:$0xff] %v814_v50  ;;  %v818_v52 = vld [vmem:[%s5375_s23 + $0x340] sm:$0xff]  ;;  %v820_v53 = vld [vmem:[%s5375_s23 + $0x350] sm:$0xff]  ;;  %817 = vst [vmem:[%s5383_s24 + $0x198] sm:$0xff] %v816_v51 }
  0x2f   : > { %819 = vst [vmem:[%s5383_s24 + $0x1a0] sm:$0xff] %v818_v52  ;;  %821 = vst [vmem:[%s5383_s24 + $0x1a8] sm:$0xff] %v820_v53  ;;  %v822_v54 = vld [vmem:[%s5375_s23 + $0x360] sm:$0xff]  ;;  %v824_v55 = vld [vmem:[%s5375_s23 + $0x370] sm:$0xff] }
  0x30   : > { %v826_v56 = vld [vmem:[%s5375_s23 + $0x380] sm:$0xff]  ;;  %823 = vst [vmem:[%s5383_s24 + $0x1b0] sm:$0xff] %v822_v54  ;;  %825 = vst [vmem:[%s5383_s24 + $0x1b8] sm:$0xff] %v824_v55  ;;  %v828_v57 = vld [vmem:[%s5375_s23 + $0x390] sm:$0xff] }
  0x31   : > { %827 = vst [vmem:[%s5383_s24 + $0x1c0] sm:$0xff] %v826_v56  ;;  %v830_v58 = vld [vmem:[%s5375_s23 + $0x3a0] sm:$0xff]  ;;  %v832_v59 = vld [vmem:[%s5375_s23 + $0x3b0] sm:$0xff]  ;;  %829 = vst [vmem:[%s5383_s24 + $0x1c8] sm:$0xff] %v828_v57 }
  0x32   : > { %831 = vst [vmem:[%s5383_s24 + $0x1d0] sm:$0xff] %v830_v58  ;;  %833 = vst [vmem:[%s5383_s24 + $0x1d8] sm:$0xff] %v832_v59  ;;  %v834_v60 = vld [vmem:[%s5375_s23 + $0x3c0] sm:$0xff]  ;;  %v836_v61 = vld [vmem:[%s5375_s23 + $0x3d0] sm:$0xff] }
  0x33   : > { %v838_v62 = vld [vmem:[%s5375_s23 + $0x3e0] sm:$0xff]  ;;  %835 = vst [vmem:[%s5383_s24 + $0x1e0] sm:$0xff] %v834_v60  ;;  %837 = vst [vmem:[%s5383_s24 + $0x1e8] sm:$0xff] %v836_v61  ;;  %v840_v63 = vld [vmem:[%s5375_s23 + $0x3f0] sm:$0xff] }
  0x34   : > { %839 = vst [vmem:[%s5383_s24 + $0x1f0] sm:$0xff] %v838_v62  ;;  %v842_v0 = vld [vmem:[%s5375_s23 + $0x400] sm:$0xff]  ;;  %v844_v1 = vld [vmem:[%s5375_s23 + $0x410] sm:$0xff]  ;;  %841 = vst [vmem:[%s5383_s24 + $0x1f8] sm:$0xff] %v840_v63 }
  0x35   : > { %843 = vst [vmem:[%s5383_s24 + $0x200] sm:$0xff] %v842_v0  ;;  %845 = vst [vmem:[%s5383_s24 + $0x208] sm:$0xff] %v844_v1  ;;  %v846_v2 = vld [vmem:[%s5375_s23 + $0x420] sm:$0xff]  ;;  %v848_v3 = vld [vmem:[%s5375_s23 + $0x430] sm:$0xff] }
  0x36   : > { %v850_v4 = vld [vmem:[%s5375_s23 + $0x440] sm:$0xff]  ;;  %847 = vst [vmem:[%s5383_s24 + $0x210] sm:$0xff] %v846_v2  ;;  %849 = vst [vmem:[%s5383_s24 + $0x218] sm:$0xff] %v848_v3  ;;  %v852_v5 = vld [vmem:[%s5375_s23 + $0x450] sm:$0xff] }
  0x37   : > { %851 = vst [vmem:[%s5383_s24 + $0x220] sm:$0xff] %v850_v4  ;;  %v854_v6 = vld [vmem:[%s5375_s23 + $0x460] sm:$0xff]  ;;  %v856_v7 = vld [vmem:[%s5375_s23 + $0x470] sm:$0xff]  ;;  %853 = vst [vmem:[%s5383_s24 + $0x228] sm:$0xff] %v852_v5 }
  0x38   : > { %855 = vst [vmem:[%s5383_s24 + $0x230] sm:$0xff] %v854_v6  ;;  %857 = vst [vmem:[%s5383_s24 + $0x238] sm:$0xff] %v856_v7  ;;  %v858_v8 = vld [vmem:[%s5375_s23 + $0x480] sm:$0xff]  ;;  %v860_v9 = vld [vmem:[%s5375_s23 + $0x490] sm:$0xff] }
  0x39   : > { %v862_v10 = vld [vmem:[%s5375_s23 + $0x4a0] sm:$0xff]  ;;  %859 = vst [vmem:[%s5383_s24 + $0x240] sm:$0xff] %v858_v8  ;;  %861 = vst [vmem:[%s5383_s24 + $0x248] sm:$0xff] %v860_v9  ;;  %v864_v11 = vld [vmem:[%s5375_s23 + $0x4b0] sm:$0xff] }
  0x3a   : > { %863 = vst [vmem:[%s5383_s24 + $0x250] sm:$0xff] %v862_v10  ;;  %v866_v12 = vld [vmem:[%s5375_s23 + $0x4c0] sm:$0xff]  ;;  %v868_v13 = vld [vmem:[%s5375_s23 + $0x4d0] sm:$0xff]  ;;  %865 = vst [vmem:[%s5383_s24 + $0x258] sm:$0xff] %v864_v11 }
  0x3b   : > { %867 = vst [vmem:[%s5383_s24 + $0x260] sm:$0xff] %v866_v12  ;;  %869 = vst [vmem:[%s5383_s24 + $0x268] sm:$0xff] %v868_v13  ;;  %v870_v14 = vld [vmem:[%s5375_s23 + $0x4e0] sm:$0xff]  ;;  %v872_v15 = vld [vmem:[%s5375_s23 + $0x4f0] sm:$0xff] }
  0x3c   : > { %v874_v16 = vld [vmem:[%s5375_s23 + $0x500] sm:$0xff]  ;;  %871 = vst [vmem:[%s5383_s24 + $0x270] sm:$0xff] %v870_v14  ;;  %873 = vst [vmem:[%s5383_s24 + $0x278] sm:$0xff] %v872_v15  ;;  %v876_v17 = vld [vmem:[%s5375_s23 + $0x510] sm:$0xff] }
  0x3d   : > { %875 = vst [vmem:[%s5383_s24 + $0x280] sm:$0xff] %v874_v16  ;;  %v878_v18 = vld [vmem:[%s5375_s23 + $0x520] sm:$0xff]  ;;  %v880_v19 = vld [vmem:[%s5375_s23 + $0x530] sm:$0xff]  ;;  %877 = vst [vmem:[%s5383_s24 + $0x288] sm:$0xff] %v876_v17 }
  0x3e   : > { %879 = vst [vmem:[%s5383_s24 + $0x290] sm:$0xff] %v878_v18  ;;  %881 = vst [vmem:[%s5383_s24 + $0x298] sm:$0xff] %v880_v19  ;;  %v882_v20 = vld [vmem:[%s5375_s23 + $0x540] sm:$0xff]  ;;  %v884_v21 = vld [vmem:[%s5375_s23 + $0x550] sm:$0xff] }
  0x3f   : > { %v886_v22 = vld [vmem:[%s5375_s23 + $0x560] sm:$0xff]  ;;  %883 = vst [vmem:[%s5383_s24 + $0x2a0] sm:$0xff] %v882_v20  ;;  %885 = vst [vmem:[%s5383_s24 + $0x2a8] sm:$0xff] %v884_v21  ;;  %v888_v23 = vld [vmem:[%s5375_s23 + $0x570] sm:$0xff] }
  0x40   : > { %887 = vst [vmem:[%s5383_s24 + $0x2b0] sm:$0xff] %v886_v22  ;;  %v890_v24 = vld [vmem:[%s5375_s23 + $0x580] sm:$0xff]  ;;  %v892_v25 = vld [vmem:[%s5375_s23 + $0x590] sm:$0xff]  ;;  %889 = vst [vmem:[%s5383_s24 + $0x2b8] sm:$0xff] %v888_v23 }
  0x41   : > { %891 = vst [vmem:[%s5383_s24 + $0x2c0] sm:$0xff] %v890_v24  ;;  %893 = vst [vmem:[%s5383_s24 + $0x2c8] sm:$0xff] %v892_v25  ;;  %v894_v26 = vld [vmem:[%s5375_s23 + $0x5a0] sm:$0xff]  ;;  %v896_v27 = vld [vmem:[%s5375_s23 + $0x5b0] sm:$0xff] }
  0x42   : > { %v898_v28 = vld [vmem:[%s5375_s23 + $0x5c0] sm:$0xff]  ;;  %895 = vst [vmem:[%s5383_s24 + $0x2d0] sm:$0xff] %v894_v26  ;;  %897 = vst [vmem:[%s5383_s24 + $0x2d8] sm:$0xff] %v896_v27  ;;  %v900_v29 = vld [vmem:[%s5375_s23 + $0x5d0] sm:$0xff] }
  0x43   : > { %899 = vst [vmem:[%s5383_s24 + $0x2e0] sm:$0xff] %v898_v28  ;;  %v902_v30 = vld [vmem:[%s5375_s23 + $0x5e0] sm:$0xff]  ;;  %v904_v31 = vld [vmem:[%s5375_s23 + $0x5f0] sm:$0xff]  ;;  %901 = vst [vmem:[%s5383_s24 + $0x2e8] sm:$0xff] %v900_v29 }
  0x44   : > { %903 = vst [vmem:[%s5383_s24 + $0x2f0] sm:$0xff] %v902_v30  ;;  %905 = vst [vmem:[%s5383_s24 + $0x2f8] sm:$0xff] %v904_v31  ;;  %v906_v32 = vld [vmem:[%s5375_s23 + $0x600] sm:$0xff]  ;;  %v908_v33 = vld [vmem:[%s5375_s23 + $0x610] sm:$0xff] }
  0x45   : > { %v910_v34 = vld [vmem:[%s5375_s23 + $0x620] sm:$0xff]  ;;  %907 = vst [vmem:[%s5383_s24 + $0x300] sm:$0xff] %v906_v32  ;;  %909 = vst [vmem:[%s5383_s24 + $0x308] sm:$0xff] %v908_v33  ;;  %v912_v35 = vld [vmem:[%s5375_s23 + $0x630] sm:$0xff] }
  0x46   : > { %911 = vst [vmem:[%s5383_s24 + $0x310] sm:$0xff] %v910_v34  ;;  %v914_v36 = vld [vmem:[%s5375_s23 + $0x640] sm:$0xff]  ;;  %v916_v37 = vld [vmem:[%s5375_s23 + $0x650] sm:$0xff]  ;;  %913 = vst [vmem:[%s5383_s24 + $0x318] sm:$0xff] %v912_v35 }
  0x47   : > { %915 = vst [vmem:[%s5383_s24 + $0x320] sm:$0xff] %v914_v36  ;;  %917 = vst [vmem:[%s5383_s24 + $0x328] sm:$0xff] %v916_v37  ;;  %v918_v38 = vld [vmem:[%s5375_s23 + $0x660] sm:$0xff]  ;;  %v920_v39 = vld [vmem:[%s5375_s23 + $0x670] sm:$0xff] }
  0x48   : > { %v922_v40 = vld [vmem:[%s5375_s23 + $0x680] sm:$0xff]  ;;  %919 = vst [vmem:[%s5383_s24 + $0x330] sm:$0xff] %v918_v38  ;;  %921 = vst [vmem:[%s5383_s24 + $0x338] sm:$0xff] %v920_v39  ;;  %v924_v41 = vld [vmem:[%s5375_s23 + $0x690] sm:$0xff] }
  0x49   : > { %923 = vst [vmem:[%s5383_s24 + $0x340] sm:$0xff] %v922_v40  ;;  %v926_v42 = vld [vmem:[%s5375_s23 + $0x6a0] sm:$0xff]  ;;  %v928_v43 = vld [vmem:[%s5375_s23 + $0x6b0] sm:$0xff]  ;;  %925 = vst [vmem:[%s5383_s24 + $0x348] sm:$0xff] %v924_v41 }
  0x4a   : > { %927 = vst [vmem:[%s5383_s24 + $0x350] sm:$0xff] %v926_v42  ;;  %929 = vst [vmem:[%s5383_s24 + $0x358] sm:$0xff] %v928_v43  ;;  %v930_v44 = vld [vmem:[%s5375_s23 + $0x6c0] sm:$0xff]  ;;  %v932_v45 = vld [vmem:[%s5375_s23 + $0x6d0] sm:$0xff] }
  0x4b   : > { %v934_v46 = vld [vmem:[%s5375_s23 + $0x6e0] sm:$0xff]  ;;  %931 = vst [vmem:[%s5383_s24 + $0x360] sm:$0xff] %v930_v44  ;;  %933 = vst [vmem:[%s5383_s24 + $0x368] sm:$0xff] %v932_v45  ;;  %v936_v47 = vld [vmem:[%s5375_s23 + $0x6f0] sm:$0xff] }
  0x4c   : > { %935 = vst [vmem:[%s5383_s24 + $0x370] sm:$0xff] %v934_v46  ;;  %v938_v48 = vld [vmem:[%s5375_s23 + $0x700] sm:$0xff]  ;;  %v940_v49 = vld [vmem:[%s5375_s23 + $0x710] sm:$0xff]  ;;  %937 = vst [vmem:[%s5383_s24 + $0x378] sm:$0xff] %v936_v47 }
  0x4d   : > { %939 = vst [vmem:[%s5383_s24 + $0x380] sm:$0xff] %v938_v48  ;;  %941 = vst [vmem:[%s5383_s24 + $0x388] sm:$0xff] %v940_v49  ;;  %v942_v50 = vld [vmem:[%s5375_s23 + $0x720] sm:$0xff]  ;;  %v944_v51 = vld [vmem:[%s5375_s23 + $0x730] sm:$0xff] }
  0x4e   : > { %v946_v52 = vld [vmem:[%s5375_s23 + $0x740] sm:$0xff]  ;;  %943 = vst [vmem:[%s5383_s24 + $0x390] sm:$0xff] %v942_v50  ;;  %945 = vst [vmem:[%s5383_s24 + $0x398] sm:$0xff] %v944_v51  ;;  %v948_v53 = vld [vmem:[%s5375_s23 + $0x750] sm:$0xff] }
  0x4f   : > { %947 = vst [vmem:[%s5383_s24 + $0x3a0] sm:$0xff] %v946_v52  ;;  %v950_v54 = vld [vmem:[%s5375_s23 + $0x760] sm:$0xff]  ;;  %v952_v55 = vld [vmem:[%s5375_s23 + $0x770] sm:$0xff]  ;;  %949 = vst [vmem:[%s5383_s24 + $0x3a8] sm:$0xff] %v948_v53 }
  0x50   : > { %951 = vst [vmem:[%s5383_s24 + $0x3b0] sm:$0xff] %v950_v54  ;;  %953 = vst [vmem:[%s5383_s24 + $0x3b8] sm:$0xff] %v952_v55  ;;  %v954_v56 = vld [vmem:[%s5375_s23 + $0x780] sm:$0xff]  ;;  %v956_v57 = vld [vmem:[%s5375_s23 + $0x790] sm:$0xff] }
  0x51   : > { %v958_v58 = vld [vmem:[%s5375_s23 + $0x7a0] sm:$0xff]  ;;  %955 = vst [vmem:[%s5383_s24 + $0x3c0] sm:$0xff] %v954_v56  ;;  %957 = vst [vmem:[%s5383_s24 + $0x3c8] sm:$0xff] %v956_v57  ;;  %v960_v59 = vld [vmem:[%s5375_s23 + $0x7b0] sm:$0xff] }
  0x52   : > { %959 = vst [vmem:[%s5383_s24 + $0x3d0] sm:$0xff] %v958_v58  ;;  %v962_v60 = vld [vmem:[%s5375_s23 + $0x7c0] sm:$0xff]  ;;  %v964_v61 = vld [vmem:[%s5375_s23 + $0x7d0] sm:$0xff]  ;;  %961 = vst [vmem:[%s5383_s24 + $0x3d8] sm:$0xff] %v960_v59 }
  0x53   : > { %963 = vst [vmem:[%s5383_s24 + $0x3e0] sm:$0xff] %v962_v60  ;;  %965 = vst [vmem:[%s5383_s24 + $0x3e8] sm:$0xff] %v964_v61  ;;  %v966_v62 = vld [vmem:[%s5375_s23 + $0x7e0] sm:$0xff]  ;;  %v968_v63 = vld [vmem:[%s5375_s23 + $0x7f0] sm:$0xff] }
  0x54   : > { %v970_v0 = vld [vmem:[%s5375_s23 + $0x800] sm:$0xff]  ;;  %967 = vst [vmem:[%s5383_s24 + $0x3f0] sm:$0xff] %v966_v62  ;;  %969 = vst [vmem:[%s5383_s24 + $0x3f8] sm:$0xff] %v968_v63  ;;  %v972_v1 = vld [vmem:[%s5375_s23 + $0x810] sm:$0xff] }
  0x55   : > { %971 = vst [vmem:[%s5383_s24 + $0x400] sm:$0xff] %v970_v0  ;;  %v974_v2 = vld [vmem:[%s5375_s23 + $0x820] sm:$0xff]  ;;  %v976_v3 = vld [vmem:[%s5375_s23 + $0x830] sm:$0xff]  ;;  %973 = vst [vmem:[%s5383_s24 + $0x408] sm:$0xff] %v972_v1 }
  0x56   : > { %975 = vst [vmem:[%s5383_s24 + $0x410] sm:$0xff] %v974_v2  ;;  %977 = vst [vmem:[%s5383_s24 + $0x418] sm:$0xff] %v976_v3  ;;  %v978_v4 = vld [vmem:[%s5375_s23 + $0x840] sm:$0xff]  ;;  %v980_v5 = vld [vmem:[%s5375_s23 + $0x850] sm:$0xff] }
  0x57   : > { %v982_v6 = vld [vmem:[%s5375_s23 + $0x860] sm:$0xff]  ;;  %979 = vst [vmem:[%s5383_s24 + $0x420] sm:$0xff] %v978_v4  ;;  %981 = vst [vmem:[%s5383_s24 + $0x428] sm:$0xff] %v980_v5  ;;  %v984_v7 = vld [vmem:[%s5375_s23 + $0x870] sm:$0xff] }
  0x58   : > { %983 = vst [vmem:[%s5383_s24 + $0x430] sm:$0xff] %v982_v6  ;;  %v986_v8 = vld [vmem:[%s5375_s23 + $0x880] sm:$0xff]  ;;  %v988_v9 = vld [vmem:[%s5375_s23 + $0x890] sm:$0xff]  ;;  %985 = vst [vmem:[%s5383_s24 + $0x438] sm:$0xff] %v984_v7 }
  0x59   : > { %987 = vst [vmem:[%s5383_s24 + $0x440] sm:$0xff] %v986_v8  ;;  %989 = vst [vmem:[%s5383_s24 + $0x448] sm:$0xff] %v988_v9  ;;  %v990_v10 = vld [vmem:[%s5375_s23 + $0x8a0] sm:$0xff]  ;;  %v992_v11 = vld [vmem:[%s5375_s23 + $0x8b0] sm:$0xff] }
  0x5a   : > { %v994_v12 = vld [vmem:[%s5375_s23 + $0x8c0] sm:$0xff]  ;;  %991 = vst [vmem:[%s5383_s24 + $0x450] sm:$0xff] %v990_v10  ;;  %993 = vst [vmem:[%s5383_s24 + $0x458] sm:$0xff] %v992_v11  ;;  %v996_v13 = vld [vmem:[%s5375_s23 + $0x8d0] sm:$0xff] }
  0x5b   : > { %995 = vst [vmem:[%s5383_s24 + $0x460] sm:$0xff] %v994_v12  ;;  %v998_v14 = vld [vmem:[%s5375_s23 + $0x8e0] sm:$0xff]  ;;  %v1000_v15 = vld [vmem:[%s5375_s23 + $0x8f0] sm:$0xff]  ;;  %997 = vst [vmem:[%s5383_s24 + $0x468] sm:$0xff] %v996_v13 }
  0x5c   : > { %999 = vst [vmem:[%s5383_s24 + $0x470] sm:$0xff] %v998_v14  ;;  %1001 = vst [vmem:[%s5383_s24 + $0x478] sm:$0xff] %v1000_v15  ;;  %v1002_v16 = vld [vmem:[%s5375_s23 + $0x900] sm:$0xff]  ;;  %v1004_v17 = vld [vmem:[%s5375_s23 + $0x910] sm:$0xff] }
  0x5d   : > { %v1006_v18 = vld [vmem:[%s5375_s23 + $0x920] sm:$0xff]  ;;  %1003 = vst [vmem:[%s5383_s24 + $0x480] sm:$0xff] %v1002_v16  ;;  %1005 = vst [vmem:[%s5383_s24 + $0x488] sm:$0xff] %v1004_v17  ;;  %v1008_v19 = vld [vmem:[%s5375_s23 + $0x930] sm:$0xff] }
  0x5e   : > { %1007 = vst [vmem:[%s5383_s24 + $0x490] sm:$0xff] %v1006_v18  ;;  %v1010_v20 = vld [vmem:[%s5375_s23 + $0x940] sm:$0xff]  ;;  %v1012_v21 = vld [vmem:[%s5375_s23 + $0x950] sm:$0xff]  ;;  %1009 = vst [vmem:[%s5383_s24 + $0x498] sm:$0xff] %v1008_v19 }
  0x5f   : > { %1011 = vst [vmem:[%s5383_s24 + $0x4a0] sm:$0xff] %v1010_v20  ;;  %1013 = vst [vmem:[%s5383_s24 + $0x4a8] sm:$0xff] %v1012_v21  ;;  %v1014_v22 = vld [vmem:[%s5375_s23 + $0x960] sm:$0xff]  ;;  %v1016_v23 = vld [vmem:[%s5375_s23 + $0x970] sm:$0xff] }
  0x60   : > { %v1018_v24 = vld [vmem:[%s5375_s23 + $0x980] sm:$0xff]  ;;  %1015 = vst [vmem:[%s5383_s24 + $0x4b0] sm:$0xff] %v1014_v22  ;;  %1017 = vst [vmem:[%s5383_s24 + $0x4b8] sm:$0xff] %v1016_v23  ;;  %v1020_v25 = vld [vmem:[%s5375_s23 + $0x990] sm:$0xff] }
  0x61   : > { %1019 = vst [vmem:[%s5383_s24 + $0x4c0] sm:$0xff] %v1018_v24  ;;  %v1022_v26 = vld [vmem:[%s5375_s23 + $0x9a0] sm:$0xff]  ;;  %v1024_v27 = vld [vmem:[%s5375_s23 + $0x9b0] sm:$0xff]  ;;  %1021 = vst [vmem:[%s5383_s24 + $0x4c8] sm:$0xff] %v1020_v25 }
  0x62   : > { %1023 = vst [vmem:[%s5383_s24 + $0x4d0] sm:$0xff] %v1022_v26  ;;  %1025 = vst [vmem:[%s5383_s24 + $0x4d8] sm:$0xff] %v1024_v27  ;;  %v1026_v28 = vld [vmem:[%s5375_s23 + $0x9c0] sm:$0xff]  ;;  %v1028_v29 = vld [vmem:[%s5375_s23 + $0x9d0] sm:$0xff] }
  0x63   : > { %v1030_v30 = vld [vmem:[%s5375_s23 + $0x9e0] sm:$0xff]  ;;  %1027 = vst [vmem:[%s5383_s24 + $0x4e0] sm:$0xff] %v1026_v28  ;;  %1029 = vst [vmem:[%s5383_s24 + $0x4e8] sm:$0xff] %v1028_v29  ;;  %v1032_v31 = vld [vmem:[%s5375_s23 + $0x9f0] sm:$0xff] }
  0x64   : > { %1031 = vst [vmem:[%s5383_s24 + $0x4f0] sm:$0xff] %v1030_v30  ;;  %v1034_v32 = vld [vmem:[%s5375_s23 + $0xa00] sm:$0xff]  ;;  %v1036_v33 = vld [vmem:[%s5375_s23 + $0xa10] sm:$0xff]  ;;  %1033 = vst [vmem:[%s5383_s24 + $0x4f8] sm:$0xff] %v1032_v31 }
  0x65   : > { %1035 = vst [vmem:[%s5383_s24 + $0x500] sm:$0xff] %v1034_v32  ;;  %1037 = vst [vmem:[%s5383_s24 + $0x508] sm:$0xff] %v1036_v33  ;;  %v1038_v34 = vld [vmem:[%s5375_s23 + $0xa20] sm:$0xff]  ;;  %v1040_v35 = vld [vmem:[%s5375_s23 + $0xa30] sm:$0xff] }
  0x66   : > { %v1042_v36 = vld [vmem:[%s5375_s23 + $0xa40] sm:$0xff]  ;;  %1039 = vst [vmem:[%s5383_s24 + $0x510] sm:$0xff] %v1038_v34  ;;  %1041 = vst [vmem:[%s5383_s24 + $0x518] sm:$0xff] %v1040_v35  ;;  %v1044_v37 = vld [vmem:[%s5375_s23 + $0xa50] sm:$0xff] }
  0x67   : > { %1043 = vst [vmem:[%s5383_s24 + $0x520] sm:$0xff] %v1042_v36  ;;  %v1046_v38 = vld [vmem:[%s5375_s23 + $0xa60] sm:$0xff]  ;;  %v1048_v39 = vld [vmem:[%s5375_s23 + $0xa70] sm:$0xff]  ;;  %1045 = vst [vmem:[%s5383_s24 + $0x528] sm:$0xff] %v1044_v37 }
  0x68   : > { %1047 = vst [vmem:[%s5383_s24 + $0x530] sm:$0xff] %v1046_v38  ;;  %1049 = vst [vmem:[%s5383_s24 + $0x538] sm:$0xff] %v1048_v39  ;;  %v1050_v40 = vld [vmem:[%s5375_s23 + $0xa80] sm:$0xff]  ;;  %v1052_v41 = vld [vmem:[%s5375_s23 + $0xa90] sm:$0xff] }
  0x69   : > { %v1054_v42 = vld [vmem:[%s5375_s23 + $0xaa0] sm:$0xff]  ;;  %1051 = vst [vmem:[%s5383_s24 + $0x540] sm:$0xff] %v1050_v40  ;;  %1053 = vst [vmem:[%s5383_s24 + $0x548] sm:$0xff] %v1052_v41  ;;  %v1056_v43 = vld [vmem:[%s5375_s23 + $0xab0] sm:$0xff] }
  0x6a   : > { %1055 = vst [vmem:[%s5383_s24 + $0x550] sm:$0xff] %v1054_v42  ;;  %v1058_v44 = vld [vmem:[%s5375_s23 + $0xac0] sm:$0xff]  ;;  %v1060_v45 = vld [vmem:[%s5375_s23 + $0xad0] sm:$0xff]  ;;  %1057 = vst [vmem:[%s5383_s24 + $0x558] sm:$0xff] %v1056_v43 }
  0x6b   : > { %1059 = vst [vmem:[%s5383_s24 + $0x560] sm:$0xff] %v1058_v44  ;;  %1061 = vst [vmem:[%s5383_s24 + $0x568] sm:$0xff] %v1060_v45  ;;  %v1062_v46 = vld [vmem:[%s5375_s23 + $0xae0] sm:$0xff]  ;;  %v1064_v47 = vld [vmem:[%s5375_s23 + $0xaf0] sm:$0xff] }
  0x6c   : > { %v1066_v48 = vld [vmem:[%s5375_s23 + $0xb00] sm:$0xff]  ;;  %1063 = vst [vmem:[%s5383_s24 + $0x570] sm:$0xff] %v1062_v46  ;;  %1065 = vst [vmem:[%s5383_s24 + $0x578] sm:$0xff] %v1064_v47  ;;  %v1068_v49 = vld [vmem:[%s5375_s23 + $0xb10] sm:$0xff] }
  0x6d   : > { %1067 = vst [vmem:[%s5383_s24 + $0x580] sm:$0xff] %v1066_v48  ;;  %v1070_v50 = vld [vmem:[%s5375_s23 + $0xb20] sm:$0xff]  ;;  %v1072_v51 = vld [vmem:[%s5375_s23 + $0xb30] sm:$0xff]  ;;  %1069 = vst [vmem:[%s5383_s24 + $0x588] sm:$0xff] %v1068_v49 }
  0x6e   : > { %1071 = vst [vmem:[%s5383_s24 + $0x590] sm:$0xff] %v1070_v50  ;;  %1073 = vst [vmem:[%s5383_s24 + $0x598] sm:$0xff] %v1072_v51  ;;  %v1074_v52 = vld [vmem:[%s5375_s23 + $0xb40] sm:$0xff]  ;;  %v1076_v53 = vld [vmem:[%s5375_s23 + $0xb50] sm:$0xff] }
  0x6f   : > { %v1078_v54 = vld [vmem:[%s5375_s23 + $0xb60] sm:$0xff]  ;;  %1075 = vst [vmem:[%s5383_s24 + $0x5a0] sm:$0xff] %v1074_v52  ;;  %1077 = vst [vmem:[%s5383_s24 + $0x5a8] sm:$0xff] %v1076_v53  ;;  %v1080_v55 = vld [vmem:[%s5375_s23 + $0xb70] sm:$0xff] }
  0x70   : > { %1079 = vst [vmem:[%s5383_s24 + $0x5b0] sm:$0xff] %v1078_v54  ;;  %v1082_v56 = vld [vmem:[%s5375_s23 + $0xb80] sm:$0xff]  ;;  %v1084_v57 = vld [vmem:[%s5375_s23 + $0xb90] sm:$0xff]  ;;  %1081 = vst [vmem:[%s5383_s24 + $0x5b8] sm:$0xff] %v1080_v55 }
  0x71   : > { %1083 = vst [vmem:[%s5383_s24 + $0x5c0] sm:$0xff] %v1082_v56  ;;  %1085 = vst [vmem:[%s5383_s24 + $0x5c8] sm:$0xff] %v1084_v57  ;;  %v1086_v58 = vld [vmem:[%s5375_s23 + $0xba0] sm:$0xff]  ;;  %v1088_v59 = vld [vmem:[%s5375_s23 + $0xbb0] sm:$0xff] }
  0x72   : > { %v1090_v60 = vld [vmem:[%s5375_s23 + $0xbc0] sm:$0xff]  ;;  %1087 = vst [vmem:[%s5383_s24 + $0x5d0] sm:$0xff] %v1086_v58  ;;  %1089 = vst [vmem:[%s5383_s24 + $0x5d8] sm:$0xff] %v1088_v59  ;;  %v1092_v61 = vld [vmem:[%s5375_s23 + $0xbd0] sm:$0xff] }
  0x73   : > { %1091 = vst [vmem:[%s5383_s24 + $0x5e0] sm:$0xff] %v1090_v60  ;;  %v1094_v62 = vld [vmem:[%s5375_s23 + $0xbe0] sm:$0xff]  ;;  %v1096_v63 = vld [vmem:[%s5375_s23 + $0xbf0] sm:$0xff]  ;;  %1093 = vst [vmem:[%s5383_s24 + $0x5e8] sm:$0xff] %v1092_v61 }
  0x74   : > { %1095 = vst [vmem:[%s5383_s24 + $0x5f0] sm:$0xff] %v1094_v62  ;;  %1097 = vst [vmem:[%s5383_s24 + $0x5f8] sm:$0xff] %v1096_v63  ;;  %v1098_v0 = vld [vmem:[%s5375_s23 + $0xc00] sm:$0xff]  ;;  %v1100_v1 = vld [vmem:[%s5375_s23 + $0xc10] sm:$0xff] }
  0x75   : > { %v1102_v2 = vld [vmem:[%s5375_s23 + $0xc20] sm:$0xff]  ;;  %1099 = vst [vmem:[%s5383_s24 + $0x600] sm:$0xff] %v1098_v0  ;;  %1101 = vst [vmem:[%s5383_s24 + $0x608] sm:$0xff] %v1100_v1  ;;  %v1104_v3 = vld [vmem:[%s5375_s23 + $0xc30] sm:$0xff] }
  0x76   : > { %1103 = vst [vmem:[%s5383_s24 + $0x610] sm:$0xff] %v1102_v2  ;;  %v1106_v4 = vld [vmem:[%s5375_s23 + $0xc40] sm:$0xff]  ;;  %v1108_v5 = vld [vmem:[%s5375_s23 + $0xc50] sm:$0xff]  ;;  %1105 = vst [vmem:[%s5383_s24 + $0x618] sm:$0xff] %v1104_v3 }
  0x77   : > { %1107 = vst [vmem:[%s5383_s24 + $0x620] sm:$0xff] %v1106_v4  ;;  %1109 = vst [vmem:[%s5383_s24 + $0x628] sm:$0xff] %v1108_v5  ;;  %v1110_v6 = vld [vmem:[%s5375_s23 + $0xc60] sm:$0xff]  ;;  %v1112_v7 = vld [vmem:[%s5375_s23 + $0xc70] sm:$0xff] }
  0x78   : > { %v1114_v8 = vld [vmem:[%s5375_s23 + $0xc80] sm:$0xff]  ;;  %1111 = vst [vmem:[%s5383_s24 + $0x630] sm:$0xff] %v1110_v6  ;;  %1113 = vst [vmem:[%s5383_s24 + $0x638] sm:$0xff] %v1112_v7  ;;  %v1116_v9 = vld [vmem:[%s5375_s23 + $0xc90] sm:$0xff] }
  0x79   : > { %1115 = vst [vmem:[%s5383_s24 + $0x640] sm:$0xff] %v1114_v8  ;;  %v1118_v10 = vld [vmem:[%s5375_s23 + $0xca0] sm:$0xff]  ;;  %v1120_v11 = vld [vmem:[%s5375_s23 + $0xcb0] sm:$0xff]  ;;  %1117 = vst [vmem:[%s5383_s24 + $0x648] sm:$0xff] %v1116_v9 }
  0x7a   : > { %1119 = vst [vmem:[%s5383_s24 + $0x650] sm:$0xff] %v1118_v10  ;;  %1121 = vst [vmem:[%s5383_s24 + $0x658] sm:$0xff] %v1120_v11  ;;  %v1122_v12 = vld [vmem:[%s5375_s23 + $0xcc0] sm:$0xff]  ;;  %v1124_v13 = vld [vmem:[%s5375_s23 + $0xcd0] sm:$0xff] }
  0x7b   : > { %v1126_v14 = vld [vmem:[%s5375_s23 + $0xce0] sm:$0xff]  ;;  %1123 = vst [vmem:[%s5383_s24 + $0x660] sm:$0xff] %v1122_v12  ;;  %1125 = vst [vmem:[%s5383_s24 + $0x668] sm:$0xff] %v1124_v13  ;;  %v1128_v15 = vld [vmem:[%s5375_s23 + $0xcf0] sm:$0xff] }
  0x7c   : > { %1127 = vst [vmem:[%s5383_s24 + $0x670] sm:$0xff] %v1126_v14  ;;  %v1130_v16 = vld [vmem:[%s5375_s23 + $0xd00] sm:$0xff]  ;;  %v1132_v17 = vld [vmem:[%s5375_s23 + $0xd10] sm:$0xff]  ;;  %1129 = vst [vmem:[%s5383_s24 + $0x678] sm:$0xff] %v1128_v15 }
  0x7d   : > { %1131 = vst [vmem:[%s5383_s24 + $0x680] sm:$0xff] %v1130_v16  ;;  %1133 = vst [vmem:[%s5383_s24 + $0x688] sm:$0xff] %v1132_v17  ;;  %v1134_v18 = vld [vmem:[%s5375_s23 + $0xd20] sm:$0xff]  ;;  %v1136_v19 = vld [vmem:[%s5375_s23 + $0xd30] sm:$0xff] }
  0x7e   : > { %v1138_v20 = vld [vmem:[%s5375_s23 + $0xd40] sm:$0xff]  ;;  %1135 = vst [vmem:[%s5383_s24 + $0x690] sm:$0xff] %v1134_v18  ;;  %1137 = vst [vmem:[%s5383_s24 + $0x698] sm:$0xff] %v1136_v19  ;;  %v1140_v21 = vld [vmem:[%s5375_s23 + $0xd50] sm:$0xff] }
  0x7f   : > { %1139 = vst [vmem:[%s5383_s24 + $0x6a0] sm:$0xff] %v1138_v20  ;;  %v1142_v22 = vld [vmem:[%s5375_s23 + $0xd60] sm:$0xff]  ;;  %v1144_v23 = vld [vmem:[%s5375_s23 + $0xd70] sm:$0xff]  ;;  %1141 = vst [vmem:[%s5383_s24 + $0x6a8] sm:$0xff] %v1140_v21 }
  0x80   : > { %1143 = vst [vmem:[%s5383_s24 + $0x6b0] sm:$0xff] %v1142_v22  ;;  %1145 = vst [vmem:[%s5383_s24 + $0x6b8] sm:$0xff] %v1144_v23  ;;  %v1146_v24 = vld [vmem:[%s5375_s23 + $0xd80] sm:$0xff]  ;;  %v1148_v25 = vld [vmem:[%s5375_s23 + $0xd90] sm:$0xff] }
  0x81   : > { %v1150_v26 = vld [vmem:[%s5375_s23 + $0xda0] sm:$0xff]  ;;  %1147 = vst [vmem:[%s5383_s24 + $0x6c0] sm:$0xff] %v1146_v24  ;;  %1149 = vst [vmem:[%s5383_s24 + $0x6c8] sm:$0xff] %v1148_v25  ;;  %v1152_v27 = vld [vmem:[%s5375_s23 + $0xdb0] sm:$0xff] }
  0x82   : > { %1151 = vst [vmem:[%s5383_s24 + $0x6d0] sm:$0xff] %v1150_v26  ;;  %v1154_v28 = vld [vmem:[%s5375_s23 + $0xdc0] sm:$0xff]  ;;  %v1156_v29 = vld [vmem:[%s5375_s23 + $0xdd0] sm:$0xff]  ;;  %1153 = vst [vmem:[%s5383_s24 + $0x6d8] sm:$0xff] %v1152_v27 }
  0x83   : > { %1155 = vst [vmem:[%s5383_s24 + $0x6e0] sm:$0xff] %v1154_v28  ;;  %1157 = vst [vmem:[%s5383_s24 + $0x6e8] sm:$0xff] %v1156_v29  ;;  %v1158_v30 = vld [vmem:[%s5375_s23 + $0xde0] sm:$0xff]  ;;  %v1160_v31 = vld [vmem:[%s5375_s23 + $0xdf0] sm:$0xff] }
  0x84   : > { %v1162_v32 = vld [vmem:[%s5375_s23 + $0xe00] sm:$0xff]  ;;  %1159 = vst [vmem:[%s5383_s24 + $0x6f0] sm:$0xff] %v1158_v30  ;;  %1161 = vst [vmem:[%s5383_s24 + $0x6f8] sm:$0xff] %v1160_v31  ;;  %v1164_v33 = vld [vmem:[%s5375_s23 + $0xe10] sm:$0xff] }
  0x85   : > { %1163 = vst [vmem:[%s5383_s24 + $0x700] sm:$0xff] %v1162_v32  ;;  %v1166_v34 = vld [vmem:[%s5375_s23 + $0xe20] sm:$0xff]  ;;  %v1168_v35 = vld [vmem:[%s5375_s23 + $0xe30] sm:$0xff]  ;;  %1165 = vst [vmem:[%s5383_s24 + $0x708] sm:$0xff] %v1164_v33 }
  0x86   : > { %1167 = vst [vmem:[%s5383_s24 + $0x710] sm:$0xff] %v1166_v34  ;;  %1169 = vst [vmem:[%s5383_s24 + $0x718] sm:$0xff] %v1168_v35  ;;  %v1170_v36 = vld [vmem:[%s5375_s23 + $0xe40] sm:$0xff]  ;;  %v1172_v37 = vld [vmem:[%s5375_s23 + $0xe50] sm:$0xff] }
  0x87   : > { %v1174_v38 = vld [vmem:[%s5375_s23 + $0xe60] sm:$0xff]  ;;  %1171 = vst [vmem:[%s5383_s24 + $0x720] sm:$0xff] %v1170_v36  ;;  %1173 = vst [vmem:[%s5383_s24 + $0x728] sm:$0xff] %v1172_v37  ;;  %v1176_v39 = vld [vmem:[%s5375_s23 + $0xe70] sm:$0xff] }
  0x88   : > { %1175 = vst [vmem:[%s5383_s24 + $0x730] sm:$0xff] %v1174_v38  ;;  %v1178_v40 = vld [vmem:[%s5375_s23 + $0xe80] sm:$0xff]  ;;  %v1180_v41 = vld [vmem:[%s5375_s23 + $0xe90] sm:$0xff]  ;;  %1177 = vst [vmem:[%s5383_s24 + $0x738] sm:$0xff] %v1176_v39 }
  0x89   : > { %1179 = vst [vmem:[%s5383_s24 + $0x740] sm:$0xff] %v1178_v40  ;;  %1181 = vst [vmem:[%s5383_s24 + $0x748] sm:$0xff] %v1180_v41  ;;  %v1182_v42 = vld [vmem:[%s5375_s23 + $0xea0] sm:$0xff]  ;;  %v1184_v43 = vld [vmem:[%s5375_s23 + $0xeb0] sm:$0xff] }
  0x8a   : > { %v1186_v44 = vld [vmem:[%s5375_s23 + $0xec0] sm:$0xff]  ;;  %1183 = vst [vmem:[%s5383_s24 + $0x750] sm:$0xff] %v1182_v42  ;;  %1185 = vst [vmem:[%s5383_s24 + $0x758] sm:$0xff] %v1184_v43  ;;  %v1188_v45 = vld [vmem:[%s5375_s23 + $0xed0] sm:$0xff] }
  0x8b   : > { %1187 = vst [vmem:[%s5383_s24 + $0x760] sm:$0xff] %v1186_v44  ;;  %v1190_v46 = vld [vmem:[%s5375_s23 + $0xee0] sm:$0xff]  ;;  %v1192_v47 = vld [vmem:[%s5375_s23 + $0xef0] sm:$0xff]  ;;  %1189 = vst [vmem:[%s5383_s24 + $0x768] sm:$0xff] %v1188_v45 }
  0x8c   : > { %1191 = vst [vmem:[%s5383_s24 + $0x770] sm:$0xff] %v1190_v46  ;;  %1193 = vst [vmem:[%s5383_s24 + $0x778] sm:$0xff] %v1192_v47  ;;  %v1194_v48 = vld [vmem:[%s5375_s23 + $0xf00] sm:$0xff]  ;;  %v1196_v49 = vld [vmem:[%s5375_s23 + $0xf10] sm:$0xff] }
  0x8d   : > { %v1198_v50 = vld [vmem:[%s5375_s23 + $0xf20] sm:$0xff]  ;;  %1195 = vst [vmem:[%s5383_s24 + $0x780] sm:$0xff] %v1194_v48  ;;  %1197 = vst [vmem:[%s5383_s24 + $0x788] sm:$0xff] %v1196_v49  ;;  %v1200_v51 = vld [vmem:[%s5375_s23 + $0xf30] sm:$0xff] }
  0x8e   : > { %1199 = vst [vmem:[%s5383_s24 + $0x790] sm:$0xff] %v1198_v50  ;;  %v1202_v52 = vld [vmem:[%s5375_s23 + $0xf40] sm:$0xff]  ;;  %v1204_v53 = vld [vmem:[%s5375_s23 + $0xf50] sm:$0xff]  ;;  %1201 = vst [vmem:[%s5383_s24 + $0x798] sm:$0xff] %v1200_v51 }
  0x8f   : > { %1203 = vst [vmem:[%s5383_s24 + $0x7a0] sm:$0xff] %v1202_v52  ;;  %1205 = vst [vmem:[%s5383_s24 + $0x7a8] sm:$0xff] %v1204_v53  ;;  %v1206_v54 = vld [vmem:[%s5375_s23 + $0xf60] sm:$0xff]  ;;  %v1208_v55 = vld [vmem:[%s5375_s23 + $0xf70] sm:$0xff] }
  0x90   : > { %v1210_v56 = vld [vmem:[%s5375_s23 + $0xf80] sm:$0xff]  ;;  %1207 = vst [vmem:[%s5383_s24 + $0x7b0] sm:$0xff] %v1206_v54  ;;  %1209 = vst [vmem:[%s5383_s24 + $0x7b8] sm:$0xff] %v1208_v55  ;;  %v1212_v57 = vld [vmem:[%s5375_s23 + $0xf90] sm:$0xff] }
  0x91   : > { %1211 = vst [vmem:[%s5383_s24 + $0x7c0] sm:$0xff] %v1210_v56  ;;  %v1214_v58 = vld [vmem:[%s5375_s23 + $0xfa0] sm:$0xff]  ;;  %v1216_v59 = vld [vmem:[%s5375_s23 + $0xfb0] sm:$0xff]  ;;  %1213 = vst [vmem:[%s5383_s24 + $0x7c8] sm:$0xff] %v1212_v57 }
  0x92   : > { %1215 = vst [vmem:[%s5383_s24 + $0x7d0] sm:$0xff] %v1214_v58  ;;  %1217 = vst [vmem:[%s5383_s24 + $0x7d8] sm:$0xff] %v1216_v59  ;;  %v1218_v60 = vld [vmem:[%s5375_s23 + $0xfc0] sm:$0xff]  ;;  %v1220_v61 = vld [vmem:[%s5375_s23 + $0xfd0] sm:$0xff] }
  0x93   : > { %v1222_v62 = vld [vmem:[%s5375_s23 + $0xfe0] sm:$0xff]  ;;  %1219 = vst [vmem:[%s5383_s24 + $0x7e0] sm:$0xff] %v1218_v60  ;;  %1221 = vst [vmem:[%s5383_s24 + $0x7e8] sm:$0xff] %v1220_v61  ;;  %v1224_v63 = vld [vmem:[%s5375_s23 + $0xff0] sm:$0xff] }
  0x94   : > { %1223 = vst [vmem:[%s5383_s24 + $0x7f0] sm:$0xff] %v1222_v62  ;;  %v1226_v0 = vld [vmem:[%s5375_s23 + $0x1000] sm:$0xff]  ;;  %v1228_v1 = vld [vmem:[%s5375_s23 + $0x1010] sm:$0xff]  ;;  %1225 = vst [vmem:[%s5383_s24 + $0x7f8] sm:$0xff] %v1224_v63 }
  0x95   : > { %1227 = vst [vmem:[%s5383_s24 + $0x800] sm:$0xff] %v1226_v0  ;;  %1229 = vst [vmem:[%s5383_s24 + $0x808] sm:$0xff] %v1228_v1  ;;  %v1230_v2 = vld [vmem:[%s5375_s23 + $0x1020] sm:$0xff]  ;;  %v1232_v3 = vld [vmem:[%s5375_s23 + $0x1030] sm:$0xff] }
  0x96   : > { %v1234_v4 = vld [vmem:[%s5375_s23 + $0x1040] sm:$0xff]  ;;  %1231 = vst [vmem:[%s5383_s24 + $0x810] sm:$0xff] %v1230_v2  ;;  %1233 = vst [vmem:[%s5383_s24 + $0x818] sm:$0xff] %v1232_v3  ;;  %v1236_v5 = vld [vmem:[%s5375_s23 + $0x1050] sm:$0xff] }
  0x97   : > { %1235 = vst [vmem:[%s5383_s24 + $0x820] sm:$0xff] %v1234_v4  ;;  %v1238_v6 = vld [vmem:[%s5375_s23 + $0x1060] sm:$0xff]  ;;  %v1240_v7 = vld [vmem:[%s5375_s23 + $0x1070] sm:$0xff]  ;;  %1237 = vst [vmem:[%s5383_s24 + $0x828] sm:$0xff] %v1236_v5 }
  0x98   : > { %1239 = vst [vmem:[%s5383_s24 + $0x830] sm:$0xff] %v1238_v6  ;;  %1241 = vst [vmem:[%s5383_s24 + $0x838] sm:$0xff] %v1240_v7  ;;  %v1242_v8 = vld [vmem:[%s5375_s23 + $0x1080] sm:$0xff]  ;;  %v1244_v9 = vld [vmem:[%s5375_s23 + $0x1090] sm:$0xff] }
  0x99   : > { %v1246_v10 = vld [vmem:[%s5375_s23 + $0x10a0] sm:$0xff]  ;;  %1243 = vst [vmem:[%s5383_s24 + $0x840] sm:$0xff] %v1242_v8  ;;  %1245 = vst [vmem:[%s5383_s24 + $0x848] sm:$0xff] %v1244_v9  ;;  %v1248_v11 = vld [vmem:[%s5375_s23 + $0x10b0] sm:$0xff] }
  0x9a   : > { %1247 = vst [vmem:[%s5383_s24 + $0x850] sm:$0xff] %v1246_v10  ;;  %v1250_v12 = vld [vmem:[%s5375_s23 + $0x10c0] sm:$0xff]  ;;  %v1252_v13 = vld [vmem:[%s5375_s23 + $0x10d0] sm:$0xff]  ;;  %1249 = vst [vmem:[%s5383_s24 + $0x858] sm:$0xff] %v1248_v11 }
  0x9b   : > { %1251 = vst [vmem:[%s5383_s24 + $0x860] sm:$0xff] %v1250_v12  ;;  %1253 = vst [vmem:[%s5383_s24 + $0x868] sm:$0xff] %v1252_v13  ;;  %v1254_v14 = vld [vmem:[%s5375_s23 + $0x10e0] sm:$0xff]  ;;  %v1256_v15 = vld [vmem:[%s5375_s23 + $0x10f0] sm:$0xff] }
  0x9c   : > { %v1258_v16 = vld [vmem:[%s5375_s23 + $0x1100] sm:$0xff]  ;;  %1255 = vst [vmem:[%s5383_s24 + $0x870] sm:$0xff] %v1254_v14  ;;  %1257 = vst [vmem:[%s5383_s24 + $0x878] sm:$0xff] %v1256_v15  ;;  %v1260_v17 = vld [vmem:[%s5375_s23 + $0x1110] sm:$0xff] }
  0x9d   : > { %1259 = vst [vmem:[%s5383_s24 + $0x880] sm:$0xff] %v1258_v16  ;;  %v1262_v18 = vld [vmem:[%s5375_s23 + $0x1120] sm:$0xff]  ;;  %v1264_v19 = vld [vmem:[%s5375_s23 + $0x1130] sm:$0xff]  ;;  %1261 = vst [vmem:[%s5383_s24 + $0x888] sm:$0xff] %v1260_v17 }
  0x9e   : > { %1263 = vst [vmem:[%s5383_s24 + $0x890] sm:$0xff] %v1262_v18  ;;  %1265 = vst [vmem:[%s5383_s24 + $0x898] sm:$0xff] %v1264_v19  ;;  %v1266_v20 = vld [vmem:[%s5375_s23 + $0x1140] sm:$0xff]  ;;  %v1268_v21 = vld [vmem:[%s5375_s23 + $0x1150] sm:$0xff] }
  0x9f   : > { %v1270_v22 = vld [vmem:[%s5375_s23 + $0x1160] sm:$0xff]  ;;  %1267 = vst [vmem:[%s5383_s24 + $0x8a0] sm:$0xff] %v1266_v20  ;;  %1269 = vst [vmem:[%s5383_s24 + $0x8a8] sm:$0xff] %v1268_v21  ;;  %v1272_v23 = vld [vmem:[%s5375_s23 + $0x1170] sm:$0xff] }
  0xa0   : > { %1271 = vst [vmem:[%s5383_s24 + $0x8b0] sm:$0xff] %v1270_v22  ;;  %v1274_v24 = vld [vmem:[%s5375_s23 + $0x1180] sm:$0xff]  ;;  %v1276_v25 = vld [vmem:[%s5375_s23 + $0x1190] sm:$0xff]  ;;  %1273 = vst [vmem:[%s5383_s24 + $0x8b8] sm:$0xff] %v1272_v23 }
  0xa1   : > { %1275 = vst [vmem:[%s5383_s24 + $0x8c0] sm:$0xff] %v1274_v24  ;;  %1277 = vst [vmem:[%s5383_s24 + $0x8c8] sm:$0xff] %v1276_v25  ;;  %v1278_v26 = vld [vmem:[%s5375_s23 + $0x11a0] sm:$0xff]  ;;  %v1280_v27 = vld [vmem:[%s5375_s23 + $0x11b0] sm:$0xff] }
  0xa2   : > { %v1282_v28 = vld [vmem:[%s5375_s23 + $0x11c0] sm:$0xff]  ;;  %1279 = vst [vmem:[%s5383_s24 + $0x8d0] sm:$0xff] %v1278_v26  ;;  %1281 = vst [vmem:[%s5383_s24 + $0x8d8] sm:$0xff] %v1280_v27  ;;  %v1284_v29 = vld [vmem:[%s5375_s23 + $0x11d0] sm:$0xff] }
  0xa3   : > { %1283 = vst [vmem:[%s5383_s24 + $0x8e0] sm:$0xff] %v1282_v28  ;;  %v1286_v30 = vld [vmem:[%s5375_s23 + $0x11e0] sm:$0xff]  ;;  %v1288_v31 = vld [vmem:[%s5375_s23 + $0x11f0] sm:$0xff]  ;;  %1285 = vst [vmem:[%s5383_s24 + $0x8e8] sm:$0xff] %v1284_v29 }
  0xa4   : > { %1287 = vst [vmem:[%s5383_s24 + $0x8f0] sm:$0xff] %v1286_v30  ;;  %1289 = vst [vmem:[%s5383_s24 + $0x8f8] sm:$0xff] %v1288_v31 }
  0xa5 PF: > { %p4215_p7 = scmp.ge.s32.totalorder %s5318_s11, 1  ;;  %p1294_p8 = scmp.lt.s32.totalorder %s5318_s11, 3 }
  0xa7   : > { %p1295_p9 = pnand %p4215_p7, %p1294_p8 }
  0xa8   : > { %s1301_s25 = sand.u32 (!%p1295_p9), 1, %s5310_s9   ;;  %v4863_v32 = vld [vmem:[%s6491_s0 + $0x4] ss:$72 sps:$4 sm:$0xff] (!%p1295_p9)  }
  0xa9   : > { %1298 = sbr.rel (%p1295_p9) target bundleno = 729 (0x2d9), region = 62  ;;  %v4869_v33 = vld [vmem:[%s6491_s0 + $0x24] ss:$72 sps:$4 sm:$0xff] (!%p1295_p9)   ;;  %3479 = vmatprep.mubr.bf16.mxu1 (!%p1295_p9), %v4863_v32 }
  0xaa   : > { %s4739_s26 = smul.u32 (!%p1295_p9), 2304, %s1301_s25  ;;  %3763 = vmatprep.mubr.bf16.mxu0 (!%p1295_p9), %v4869_v33 }
  0xab   : > { %s4740_s18 = smul.u32 (!%p1295_p9), 112, %s1301_s25 }
  0xac   : > { %s5966_s3 = scalar_lea.vmem (!%p1295_p9), [#allocation2], %s4739_s26 }
  0xad   : > { %v4765_v34 = vld [vmem:[%s5966_s3 + $0x4] ss:$8 sps:$4 sm:$0xff] (!%p1295_p9)   ;;  %v4769_v36 = vld [vmem:[%s5966_s3] ss:$8 sps:$4 sm:$0xff] (!%p1295_p9)   ;;  %v4771_v38 = vld [vmem:[%s5966_s3 + $0x14] ss:$8 sps:$4 sm:$0xff] (!%p1295_p9)  }
  0xae   : > { %v4767_v35 = vld [vmem:[%s5966_s3 + $0x404] ss:$8 sps:$4 sm:$0xff] (!%p1295_p9)   ;;  %3447 = vmatprep.subr.bf16.mxu1 (!%p1295_p9), %v4765_v34  ;;  %v4770_v37 = vld [vmem:[%s5966_s3 + $0x400] ss:$8 sps:$4 sm:$0xff] (!%p1295_p9)   ;;  %v4773_v39 = vld [vmem:[%s5966_s3 + $0x414] ss:$8 sps:$4 sm:$0xff] (!%p1295_p9)  }
  0xaf   : > { %3731 = vmatprep.subr.bf16.mxu0 (!%p1295_p9), %v4767_v35  ;;  %3448 = vmatpush1.bf16.msra.mxu1 (!%p1295_p9), %v4769_v36  ;;  %v4775_v40 = vld [vmem:[%s5966_s3 + $0x10] ss:$8 sps:$4 sm:$0xff] (!%p1295_p9)   ;;  %v4777_v42 = vld [vmem:[%s5966_s3 + $0x24] ss:$8 sps:$4 sm:$0xff] (!%p1295_p9)   ;;  %v4781_v44 = vld [vmem:[%s5966_s3 + $0x20] ss:$8 sps:$4 sm:$0xff] (!%p1295_p9)  }
  0xb0   : > { %3732 = vmatpush1.bf16.msra.mxu0 %v4770_v37  ;;  %3449 = vmatprep.subr.bf16.mxu1 %v4771_v38  ;;  %v4776_v41 = vld [vmem:[%s5966_s3 + $0x410] ss:$8 sps:$4 sm:$0xff]   ;;  %v4779_v43 = vld [vmem:[%s5966_s3 + $0x424] ss:$8 sps:$4 sm:$0xff]   ;;  %v4782_v45 = vld [vmem:[%s5966_s3 + $0x420] ss:$8 sps:$4 sm:$0xff]  }
  0xb1   : > { %3733 = vmatprep.subr.bf16.mxu0 %v4773_v39  ;;  %v4783_v46 = vld [vmem:[%s5966_s3 + $0x34] ss:$8 sps:$4 sm:$0xff]   ;;  %v4787_v48 = vld [vmem:[%s5966_s3 + $0x30] ss:$8 sps:$4 sm:$0xff]   ;;  %v4789_v50 = vld [vmem:[%s5966_s3 + $0x44] ss:$8 sps:$4 sm:$0xff]  }
  0xb2   : > { %v4785_v47 = vld [vmem:[%s5966_s3 + $0x434] ss:$8 sps:$4 sm:$0xff]   ;;  %v4788_v49 = vld [vmem:[%s5966_s3 + $0x430] ss:$8 sps:$4 sm:$0xff]   ;;  %v4791_v51 = vld [vmem:[%s5966_s3 + $0x444] ss:$8 sps:$4 sm:$0xff]  }
  0xb3   : > { %3450 = vmatpush1.bf16.msra.mxu1 %v4775_v40  ;;  %v4793_v52 = vld [vmem:[%s5966_s3 + $0x40] ss:$8 sps:$4 sm:$0xff]   ;;  %v4795_v54 = vld [vmem:[%s5966_s3 + $0x54] ss:$8 sps:$4 sm:$0xff]   ;;  %v4799_v56 = vld [vmem:[%s5966_s3 + $0x50] ss:$8 sps:$4 sm:$0xff]  }
  0xb4   : > { %3734 = vmatpush1.bf16.msra.mxu0 %v4776_v41  ;;  %3451 = vmatprep.subr.bf16.mxu1 %v4777_v42  ;;  %v4794_v53 = vld [vmem:[%s5966_s3 + $0x440] ss:$8 sps:$4 sm:$0xff]   ;;  %v4797_v55 = vld [vmem:[%s5966_s3 + $0x454] ss:$8 sps:$4 sm:$0xff]   ;;  %v4800_v57 = vld [vmem:[%s5966_s3 + $0x450] ss:$8 sps:$4 sm:$0xff]  }
  0xb5   : > { %3735 = vmatprep.subr.bf16.mxu0 %v4779_v43  ;;  %v4801_v58 = vld [vmem:[%s5966_s3 + $0x64] ss:$8 sps:$4 sm:$0xff]   ;;  %v4805_v60 = vld [vmem:[%s5966_s3 + $0x60] ss:$8 sps:$4 sm:$0xff]   ;;  %v4807_v62 = vld [vmem:[%s5966_s3 + $0x74] ss:$8 sps:$4 sm:$0xff]  }
  0xb6   : > { %v4803_v59 = vld [vmem:[%s5966_s3 + $0x464] ss:$8 sps:$4 sm:$0xff]   ;;  %v4806_v61 = vld [vmem:[%s5966_s3 + $0x460] ss:$8 sps:$4 sm:$0xff]   ;;  %v4809_v63 = vld [vmem:[%s5966_s3 + $0x474] ss:$8 sps:$4 sm:$0xff]  }
  0xb7   : > { %3452 = vmatpush1.bf16.msra.mxu1 %v4781_v44  ;;  %v4811_v0 = vld [vmem:[%s5966_s3 + $0x70] ss:$8 sps:$4 sm:$0xff]   ;;  %v4813_v2 = vld [vmem:[%s5966_s3 + $0x84] ss:$8 sps:$4 sm:$0xff]   ;;  %v4817_v4 = vld [vmem:[%s5966_s3 + $0x80] ss:$8 sps:$4 sm:$0xff]  }
  0xb8   : > { %3736 = vmatpush1.bf16.msra.mxu0 %v4782_v45  ;;  %3453 = vmatprep.subr.bf16.mxu1 %v4783_v46  ;;  %v4812_v1 = vld [vmem:[%s5966_s3 + $0x470] ss:$8 sps:$4 sm:$0xff]   ;;  %v4815_v3 = vld [vmem:[%s5966_s3 + $0x484] ss:$8 sps:$4 sm:$0xff]   ;;  %v4818_v5 = vld [vmem:[%s5966_s3 + $0x480] ss:$8 sps:$4 sm:$0xff]  }
  0xb9   : > { %3737 = vmatprep.subr.bf16.mxu0 %v4785_v47  ;;  %v4819_v6 = vld [vmem:[%s5966_s3 + $0x94] ss:$8 sps:$4 sm:$0xff]   ;;  %v4823_v8 = vld [vmem:[%s5966_s3 + $0x90] ss:$8 sps:$4 sm:$0xff]   ;;  %v4825_v10 = vld [vmem:[%s5966_s3 + $0xa4] ss:$8 sps:$4 sm:$0xff]  }
  0xba   : > { %v4821_v7 = vld [vmem:[%s5966_s3 + $0x494] ss:$8 sps:$4 sm:$0xff]   ;;  %v4824_v9 = vld [vmem:[%s5966_s3 + $0x490] ss:$8 sps:$4 sm:$0xff]   ;;  %v4827_v11 = vld [vmem:[%s5966_s3 + $0x4a4] ss:$8 sps:$4 sm:$0xff]  }
  0xbb   : > { %3454 = vmatpush1.bf16.msra.mxu1 %v4787_v48  ;;  %v4829_v12 = vld [vmem:[%s5966_s3 + $0xa0] ss:$8 sps:$4 sm:$0xff]   ;;  %v4831_v14 = vld [vmem:[%s5966_s3 + $0xb4] ss:$8 sps:$4 sm:$0xff]   ;;  %v4835_v16 = vld [vmem:[%s5966_s3 + $0xb0] ss:$8 sps:$4 sm:$0xff]  }
  0xbc   : > { %3738 = vmatpush1.bf16.msra.mxu0 %v4788_v49  ;;  %3455 = vmatprep.subr.bf16.mxu1 %v4789_v50  ;;  %v4830_v13 = vld [vmem:[%s5966_s3 + $0x4a0] ss:$8 sps:$4 sm:$0xff]   ;;  %v4833_v15 = vld [vmem:[%s5966_s3 + $0x4b4] ss:$8 sps:$4 sm:$0xff]   ;;  %v4836_v17 = vld [vmem:[%s5966_s3 + $0x4b0] ss:$8 sps:$4 sm:$0xff]  }
  0xbd   : > { %3739 = vmatprep.subr.bf16.mxu0 %v4791_v51  ;;  %v4837_v18 = vld [vmem:[%s5966_s3 + $0xc4] ss:$8 sps:$4 sm:$0xff]   ;;  %v4841_v20 = vld [vmem:[%s5966_s3 + $0xc0] ss:$8 sps:$4 sm:$0xff]   ;;  %v4843_v22 = vld [vmem:[%s5966_s3 + $0xd4] ss:$8 sps:$4 sm:$0xff]  }
  0xbe   : > { %v4839_v19 = vld [vmem:[%s5966_s3 + $0x4c4] ss:$8 sps:$4 sm:$0xff]   ;;  %v4842_v21 = vld [vmem:[%s5966_s3 + $0x4c0] ss:$8 sps:$4 sm:$0xff]   ;;  %v4845_v23 = vld [vmem:[%s5966_s3 + $0x4d4] ss:$8 sps:$4 sm:$0xff]  }
  0xbf   : > { %3456 = vmatpush1.bf16.msra.mxu1 %v4793_v52  ;;  %v4847_v24 = vld [vmem:[%s5966_s3 + $0xd0] ss:$8 sps:$4 sm:$0xff]   ;;  %v4849_v26 = vld [vmem:[%s5966_s3 + $0xe4] ss:$8 sps:$4 sm:$0xff]   ;;  %v4853_v28 = vld [vmem:[%s5966_s3 + $0xe0] ss:$8 sps:$4 sm:$0xff]  }
  0xc0   : > { %3740 = vmatpush1.bf16.msra.mxu0 %v4794_v53  ;;  %3457 = vmatprep.subr.bf16.mxu1 %v4795_v54  ;;  %v4848_v25 = vld [vmem:[%s5966_s3 + $0x4d0] ss:$8 sps:$4 sm:$0xff]   ;;  %v4851_v27 = vld [vmem:[%s5966_s3 + $0x4e4] ss:$8 sps:$4 sm:$0xff]   ;;  %v4854_v29 = vld [vmem:[%s5966_s3 + $0x4e0] ss:$8 sps:$4 sm:$0xff]  }
  0xc1   : > { %3741 = vmatprep.subr.bf16.mxu0 %v4797_v55  ;;  %v4855_v30 = vld [vmem:[%s5966_s3 + $0xf4] ss:$8 sps:$4 sm:$0xff]   ;;  %v4859_v32 = vld [vmem:[%s5966_s3 + $0xf0] ss:$8 sps:$4 sm:$0xff]   ;;  %v4866_v34 = vld [vmem:[%s5966_s3 + $0x104] ss:$8 sps:$4 sm:$0xff]  }
  0xc2   : > { %v4857_v31 = vld [vmem:[%s5966_s3 + $0x4f4] ss:$8 sps:$4 sm:$0xff]   ;;  %v4860_v33 = vld [vmem:[%s5966_s3 + $0x4f0] ss:$8 sps:$4 sm:$0xff]   ;;  %v4872_v35 = vld [vmem:[%s5966_s3 + $0x504] ss:$8 sps:$4 sm:$0xff]  }
  0xc3   : > { %3458 = vmatpush1.bf16.msra.mxu1 %v4799_v56  ;;  %v4861_v36 = vld [vmem:[%s6491_s0] ss:$72 sps:$4 sm:$0xff]   ;;  %v4875_v40 = vld [vmem:[%s5966_s3 + $0x114] ss:$8 sps:$4 sm:$0xff]   ;;  %v4873_v43 = vld [vmem:[%s5966_s3 + $0x110] ss:$8 sps:$4 sm:$0xff]  }
  0xc4   : > { %3742 = vmatpush1.bf16.msra.mxu0 %v4800_v57  ;;  %3459 = vmatprep.subr.bf16.mxu1 %v4801_v58  ;;  %v4867_v37 = vld [vmem:[%s6491_s0 + $0x20] ss:$72 sps:$4 sm:$0xff]   ;;  %v4878_v41 = vld [vmem:[%s5966_s3 + $0x514] ss:$8 sps:$4 sm:$0xff]   ;;  %v4876_v44 = vld [vmem:[%s5966_s3 + $0x510] ss:$8 sps:$4 sm:$0xff]  }
  0xc5   : > { %3743 = vmatprep.subr.bf16.mxu0 %v4803_v59  ;;  %v4864_v38 = vld [vmem:[%s5966_s3 + $0x100] ss:$8 sps:$4 sm:$0xff]   ;;  %v4927_v42 = vld [vmem:[%s6491_s0 + $0x94] ss:$72 sps:$4 sm:$0xff]   ;;  %v4881_v45 = vld [vmem:[%s5966_s3 + $0x124] ss:$8 sps:$4 sm:$0xff]  }
  0xc6   : > { %v4870_v39 = vld [vmem:[%s5966_s3 + $0x500] ss:$8 sps:$4 sm:$0xff]   ;;  %v4884_v46 = vld [vmem:[%s5966_s3 + $0x524] ss:$8 sps:$4 sm:$0xff]   ;;  %v4932_v49 = vld [vmem:[%s6491_s0 + $0xb4] ss:$72 sps:$4 sm:$0xff]  }
  0xc7   : > { %3460 = vmatpush1.bf16.msra.mxu1 %v4805_v60  ;;  %v4879_v47 = vld [vmem:[%s5966_s3 + $0x120] ss:$8 sps:$4 sm:$0xff]   ;;  %v4887_v50 = vld [vmem:[%s5966_s3 + $0x134] ss:$8 sps:$4 sm:$0xff]   ;;  %v4937_v52 = vld [vmem:[%s6491_s0 + $0x90] ss:$72 sps:$4 sm:$0xff]  }
  0xc8   : > { %3744 = vmatpush1.bf16.msra.mxu0 %v4806_v61  ;;  %3461 = vmatprep.subr.bf16.mxu1 %v4807_v62  ;;  %v4882_v48 = vld [vmem:[%s5966_s3 + $0x520] ss:$8 sps:$4 sm:$0xff]   ;;  %v4890_v51 = vld [vmem:[%s5966_s3 + $0x534] ss:$8 sps:$4 sm:$0xff]   ;;  %v4938_v53 = vld [vmem:[%s6491_s0 + $0xb0] ss:$72 sps:$4 sm:$0xff]  }
  0xc9   : > { %3745 = vmatprep.subr.bf16.mxu0 %v4809_v63  ;;  %v4885_v54 = vld [vmem:[%s5966_s3 + $0x130] ss:$8 sps:$4 sm:$0xff]   ;;  %v4893_v56 = vld [vmem:[%s5966_s3 + $0x144] ss:$8 sps:$4 sm:$0xff]   ;;  %v4891_v59 = vld [vmem:[%s5966_s3 + $0x140] ss:$8 sps:$4 sm:$0xff]  }
  0xca   : > { %v4888_v55 = vld [vmem:[%s5966_s3 + $0x530] ss:$8 sps:$4 sm:$0xff]   ;;  %v4945_v57 = vld [vmem:[%s6491_s0 + $0x124] ss:$72 sps:$4 sm:$0xff]   ;;  %v4894_v60 = vld [vmem:[%s5966_s3 + $0x540] ss:$8 sps:$4 sm:$0xff]  }
  0xcb   : > { %3462 = vmatpush1.bf16.msra.mxu1 %v4811_v0  ;;  %v4896_v58 = vld [vmem:[%s5966_s3 + $0x544] ss:$8 sps:$4 sm:$0xff]   ;;  %v4899_v62 = vld [vmem:[%s5966_s3 + $0x154] ss:$8 sps:$4 sm:$0xff]   ;;  %v4955_v0 = vld [vmem:[%s6491_s0 + $0x120] ss:$72 sps:$4 sm:$0xff]  }
  0xcc   : > { %3746 = vmatpush1.bf16.msra.mxu0 %v4812_v1  ;;  %3463 = vmatprep.subr.bf16.mxu1 %v4813_v2  ;;  %v4950_v61 = vld [vmem:[%s6491_s0 + $0x144] ss:$72 sps:$4 sm:$0xff]   ;;  %v4902_v63 = vld [vmem:[%s5966_s3 + $0x554] ss:$8 sps:$4 sm:$0xff]   ;;  %v4956_v1 = vld [vmem:[%s6491_s0 + $0x140] ss:$72 sps:$4 sm:$0xff]  }
  0xcd   : > { %3747 = vmatprep.subr.bf16.mxu0 %v4815_v3  ;;  %v4897_v2 = vld [vmem:[%s5966_s3 + $0x150] ss:$8 sps:$4 sm:$0xff]   ;;  %s6443_s19 = scalar_lea.vmem [#allocation3], %s4740_s18  ;;  %s4581_s9 = sshll.u32 (%p5365_p5), %s4209_s12, 4 }
  0xce   : > { %v4900_v3 = vld [vmem:[%s5966_s3 + $0x550] ss:$8 sps:$4 sm:$0xff]   ;;  %s4109_s17 = scalar_lea.vmem (%p5365_p5), %s6493_s2, %s4581_s9 }
  0xcf   : > { %3464 = vmatpush1.bf16.msra.mxu1 %v4817_v4  ;;  %v1377_v4 = vld [vmem:[%s6491_s0 + $0x1b0] sm:$0x11] }
  0xd0   : > { %3748 = vmatpush1.bf16.msra.mxu0 %v4818_v5  ;;  %3465 = vmatprep.subr.bf16.mxu1 %v4819_v6  ;;  %v4905_v5 = vld [vmem:[%s5966_s3 + $0x164] ss:$8 sps:$4 sm:$0xff]  }
  0xd1   : > { %3749 = vmatprep.subr.bf16.mxu0 %v4821_v7  ;;  %v4908_v6 = vld [vmem:[%s5966_s3 + $0x564] ss:$8 sps:$4 sm:$0xff]   ;;  %v4271_v7 = vcombine.high %v1377_v4, %v1377_v4 }
  0xd3   : > { %3466 = vmatpush1.bf16.msra.mxu1 %v4823_v8  ;;  %v1381_v8 = vld [vmem:[%s6491_s0 + $0x1d0] sm:$0x11] }
  0xd4   : > { %3750 = vmatpush1.bf16.msra.mxu0 %v4824_v9  ;;  %3467 = vmatprep.subr.bf16.mxu1 %v4825_v10  ;;  %v4279_v9 = vcombine.high %v1381_v8, %v1381_v8  ;;  %v4270_v10 = vcombine.low %v1377_v4, %v1377_v4  ;;  %v5056_v4 = vld [vmem:[%s6491_s0 + $0xb8] ss:$72 sps:$4 sm:$0xff]  }
  0xd5   : > { %3751 = vmatprep.subr.bf16.mxu0 %v4827_v11  ;;  %v4278_v11 = vcombine.low %v1381_v8, %v1381_v8  ;;  %v5063_v8 = vld [vmem:[%s6491_s0 + $0x12c] ss:$72 sps:$4 sm:$0xff]  }
  0xd7   : > { %3468 = vmatpush1.bf16.msra.mxu1 %v4829_v12  ;;  %v4903_v12 = vld [vmem:[%s5966_s3 + $0x160] ss:$8 sps:$4 sm:$0xff]  }
  0xd8   : > { %3752 = vmatpush1.bf16.msra.mxu0 %v4830_v13  ;;  %3469 = vmatprep.subr.bf16.mxu1 %v4831_v14  ;;  %v4906_v13 = vld [vmem:[%s5966_s3 + $0x560] ss:$8 sps:$4 sm:$0xff]   ;;  %v4911_v14 = vld [vmem:[%s5966_s3 + $0x174] ss:$8 sps:$4 sm:$0xff]  }
  0xd9   : > { %3753 = vmatprep.subr.bf16.mxu0 %v4833_v15  ;;  %v4914_v15 = vld [vmem:[%s5966_s3 + $0x574] ss:$8 sps:$4 sm:$0xff]  }
  0xdb   : > { %3470 = vmatpush1.bf16.msra.mxu1 %v4835_v16  ;;  %v4909_v16 = vld [vmem:[%s5966_s3 + $0x170] ss:$8 sps:$4 sm:$0xff]  }
  0xdc   : > { %3754 = vmatpush1.bf16.msra.mxu0 %v4836_v17  ;;  %3471 = vmatprep.subr.bf16.mxu1 %v4837_v18  ;;  %v4981_v17 = vld [vmem:[%s6491_s0 + $0xc] ss:$72 sps:$4 sm:$0xff]   ;;  %v4912_v18 = vld [vmem:[%s5966_s3 + $0x570] ss:$8 sps:$4 sm:$0xff]  }
  0xdd   : > { %3755 = vmatprep.subr.bf16.mxu0 %v4839_v19  ;;  %v4917_v19 = vld [vmem:[%s5966_s3 + $0x184] ss:$8 sps:$4 sm:$0xff]  }
  0xdf   : > { %3472 = vmatpush1.bf16.msra.mxu1 %v4841_v20  ;;  %v4920_v20 = vld [vmem:[%s5966_s3 + $0x584] ss:$8 sps:$4 sm:$0xff]  }
  0xe0   : > { %3756 = vmatpush1.bf16.msra.mxu0 %v4842_v21  ;;  %3473 = vmatprep.subr.bf16.mxu1 %v4843_v22  ;;  %v4987_v21 = vld [vmem:[%s6491_s0 + $0x2c] ss:$72 sps:$4 sm:$0xff]   ;;  %v4915_v22 = vld [vmem:[%s5966_s3 + $0x180] ss:$8 sps:$4 sm:$0xff]  }
  0xe1   : > { %3757 = vmatprep.subr.bf16.mxu0 %v4845_v23  ;;  %v4918_v23 = vld [vmem:[%s5966_s3 + $0x580] ss:$8 sps:$4 sm:$0xff]  }
  0xe3   : > { %3474 = vmatpush1.bf16.msra.mxu1 %v4847_v24  ;;  %v4923_v24 = vld [vmem:[%s5966_s3 + $0x194] ss:$8 sps:$4 sm:$0xff]  }
  0xe4   : > { %3758 = vmatpush1.bf16.msra.mxu0 %v4848_v25  ;;  %3475 = vmatprep.subr.bf16.mxu1 %v4849_v26  ;;  %v4926_v25 = vld [vmem:[%s5966_s3 + $0x594] ss:$8 sps:$4 sm:$0xff]   ;;  %v4921_v26 = vld [vmem:[%s5966_s3 + $0x190] ss:$8 sps:$4 sm:$0xff]  }
  0xe5   : > { %3759 = vmatprep.subr.bf16.mxu0 %v4851_v27  ;;  %v4924_v27 = vld [vmem:[%s5966_s3 + $0x590] ss:$8 sps:$4 sm:$0xff]  }
  0xe7   : > { %3476 = vmatpush1.bf16.msra.mxu1 %v4853_v28  ;;  %v4931_v28 = vld [vmem:[%s5966_s3 + $0x1a4] ss:$8 sps:$4 sm:$0xff]  }
  0xe8   : > { %3760 = vmatpush1.bf16.msra.mxu0 %v4854_v29  ;;  %3477 = vmatprep.subr.bf16.mxu1 %v4855_v30  ;;  %v4936_v29 = vld [vmem:[%s5966_s3 + $0x5a4] ss:$8 sps:$4 sm:$0xff]   ;;  %v4929_v30 = vld [vmem:[%s5966_s3 + $0x1a0] ss:$8 sps:$4 sm:$0xff]  }
  0xe9   : > { %3761 = vmatprep.subr.bf16.mxu0 %v4857_v31  ;;  %v4934_v31 = vld [vmem:[%s5966_s3 + $0x5a0] ss:$8 sps:$4 sm:$0xff]  }
  0xeb   : > { %3478 = vmatpush1.bf16.msra.mxu1 %v4859_v32  ;;  %v4941_v32 = vld [vmem:[%s5966_s3 + $0x1b4] ss:$8 sps:$4 sm:$0xff]  }
  0xec   : > { %3762 = vmatpush1.bf16.msra.mxu0 %v4860_v33  ;;  %3518 = vmatprep.subr.bf16.mxu1 %v4866_v34  ;;  %v4944_v33 = vld [vmem:[%s5966_s3 + $0x5b4] ss:$8 sps:$4 sm:$0xff]   ;;  %v4939_v34 = vld [vmem:[%s5966_s3 + $0x1b0] ss:$8 sps:$4 sm:$0xff]  }
  0xed   : > { %3802 = vmatprep.subr.bf16.mxu0 %v4872_v35  ;;  %v4942_v35 = vld [vmem:[%s5966_s3 + $0x5b0] ss:$8 sps:$4 sm:$0xff]  }
  0xee   : > { %3480 = vmatmul.mubr.bf16.vlgmr.msra.gmra.mrb[0].mxu1 %v4861_v36  ;;  %v4949_v36 = vld [vmem:[%s5966_s3 + $0x1c4] ss:$8 sps:$4 sm:$0xff]  }
  0xef   : > { %3764 = vmatmul.mubr.bf16.vlgmr.msra.gmra.mrb[0].mxu0 %v4867_v37  ;;  %3519 = vmatpush1.bf16.msra.mxu1 %v4864_v38  ;;  %v4954_v37 = vld [vmem:[%s5966_s3 + $0x5c4] ss:$8 sps:$4 sm:$0xff]   ;;  %v4947_v38 = vld [vmem:[%s5966_s3 + $0x1c0] ss:$8 sps:$4 sm:$0xff]  }
  0xf0   : > { %3803 = vmatpush1.bf16.msra.mxu0 %v4870_v39  ;;  %3520 = vmatprep.subr.bf16.mxu1 %v4875_v40  ;;  %v4952_v39 = vld [vmem:[%s5966_s3 + $0x5c0] ss:$8 sps:$4 sm:$0xff]   ;;  %v4959_v40 = vld [vmem:[%s5966_s3 + $0x1d4] ss:$8 sps:$4 sm:$0xff]  }
  0xf1   : > { %3804 = vmatprep.subr.bf16.mxu0 %v4878_v41  ;;  %3489 = vmatprep.mubr.bf16.mxu1 %v4927_v42  ;;  %v4962_v41 = vld [vmem:[%s5966_s3 + $0x5d4] ss:$8 sps:$4 sm:$0xff]   ;;  %v4957_v42 = vld [vmem:[%s5966_s3 + $0x1d0] ss:$8 sps:$4 sm:$0xff]  }
  0xf2   : > { %3773 = vmatprep.mubr.bf16.mxu0 %v4932_v49  ;;  %v4978_v49 = vld [vmem:[%s5966_s3 + $0x5f4] ss:$8 sps:$4 sm:$0xff]  }
  0xf3   : > { %3521 = vmatpush1.bf16.msra.mxu1 %v4873_v43  ;;  %v4960_v43 = vld [vmem:[%s5966_s3 + $0x5d0] ss:$8 sps:$4 sm:$0xff]  }
  0xf4   : > { %3805 = vmatpush1.bf16.msra.mxu0 %v4876_v44  ;;  %3522 = vmatprep.subr.bf16.mxu1 %v4881_v45  ;;  %v4966_v44 = vld [vmem:[%s5966_s3 + $0x1e4] ss:$8 sps:$4 sm:$0xff]  }
  0xf5   : > { %3806 = vmatprep.subr.bf16.mxu0 %v4884_v46  ;;  %v4970_v45 = vld [vmem:[%s5966_s3 + $0x5e4] ss:$8 sps:$4 sm:$0xff]   ;;  %v4964_v46 = vld [vmem:[%s5966_s3 + $0x1e0] ss:$8 sps:$4 sm:$0xff]  }
  0xf6   : > { %3490 = vmatmul.mubr.bf16.gmra.mrb[4].mxu1 %v4937_v52  ;;  %v4979_v52 = vld [vmem:[%s6491_s0 + $0x8] ss:$72 sps:$4 sm:$0xff]  }
  0xf7   : > { %3774 = vmatmul.mubr.bf16.gmra.mrb[4].mxu0 %v4938_v53  ;;  %3523 = vmatpush1.bf16.msra.mxu1 %v4879_v47  ;;  %v4968_v47 = vld [vmem:[%s5966_s3 + $0x5e0] ss:$8 sps:$4 sm:$0xff]   ;;  %v4984_v53 = vld [vmem:[%s5966_s3 + $0x204] ss:$8 sps:$4 sm:$0xff]  }
  0xf8   : > { %3807 = vmatpush1.bf16.msra.mxu0 %v4882_v48  ;;  %3524 = vmatprep.subr.bf16.mxu1 %v4887_v50  ;;  %v4975_v48 = vld [vmem:[%s5966_s3 + $0x1f4] ss:$8 sps:$4 sm:$0xff]   ;;  %v4973_v50 = vld [vmem:[%s5966_s3 + $0x1f0] ss:$8 sps:$4 sm:$0xff]  }
  0xf9   : > { %3808 = vmatprep.subr.bf16.mxu0 %v4890_v51  ;;  %3499 = vmatprep.mubr.bf16.mxu1 %v4945_v57  ;;  %v4976_v51 = vld [vmem:[%s5966_s3 + $0x5f0] ss:$8 sps:$4 sm:$0xff]   ;;  %v4988_v57 = vld [vmem:[%s5966_s3 + $0x600] ss:$8 sps:$4 sm:$0xff]  }
  0xfa   : > { %3783 = vmatprep.mubr.bf16.mxu0 %v4950_v61  ;;  %v5050_v61 = vld [vmem:[%s6491_s0 + $0xbc] ss:$72 sps:$4 sm:$0xff]  }
  0xfb   : > { %3525 = vmatpush1.bf16.msra.mxu1 %v4885_v54  ;;  %v4990_v54 = vld [vmem:[%s5966_s3 + $0x604] ss:$8 sps:$4 sm:$0xff]  }
  0xfc   : > { %3809 = vmatpush1.bf16.msra.mxu0 %v4888_v55  ;;  %3526 = vmatprep.subr.bf16.mxu1 %v4893_v56  ;;  %v4982_v55 = vld [vmem:[%s5966_s3 + $0x200] ss:$8 sps:$4 sm:$0xff]  }
  0xfd   : > { %3810 = vmatprep.subr.bf16.mxu0 %v4896_v58  ;;  %v4985_v56 = vld [vmem:[%s6491_s0 + $0x28] ss:$72 sps:$4 sm:$0xff]   ;;  %v4993_v58 = vld [vmem:[%s5966_s3 + $0x214] ss:$8 sps:$4 sm:$0xff]  }
  0xfe   : > { %3500 = vmatmul.mubr.bf16.gmra.mrb[8].mxu1 %v4955_v0  ;;  %v4999_v0 = vld [vmem:[%s5966_s3 + $0x224] ss:$8 sps:$4 sm:$0xff]  }
  0xff   : > { %3784 = vmatmul.mubr.bf16.gmra.mrb[8].mxu0 %v4956_v1  ;;  %3527 = vmatpush1.bf16.msra.mxu1 %v4891_v59  ;;  %v4996_v59 = vld [vmem:[%s5966_s3 + $0x614] ss:$8 sps:$4 sm:$0xff]   ;;  %v5002_v1 = vld [vmem:[%s5966_s3 + $0x624] ss:$8 sps:$4 sm:$0xff]  }
 0x100   : > { %3811 = vmatpush1.bf16.msra.mxu0 %v4894_v60  ;;  %3528 = vmatprep.subr.bf16.mxu1 %v4899_v62  ;;  %v5045_v60 = vld [vmem:[%s6491_s0 + $0x9c] ss:$72 sps:$4 sm:$0xff]   ;;  %v4991_v62 = vld [vmem:[%s5966_s3 + $0x210] ss:$8 sps:$4 sm:$0xff]  }
 0x101   : > { %3812 = vmatprep.subr.bf16.mxu0 %v4902_v63  ;;  %3509 = vmatprep.mubr.bf16.mxu1 %v4271_v7  ;;  %v4994_v63 = vld [vmem:[%s5966_s3 + $0x610] ss:$8 sps:$4 sm:$0xff]   ;;  %v5008_v7 = vld [vmem:[%s5966_s3 + $0x634] ss:$8 sps:$4 sm:$0xff]  }
 0x102   : > { %3793 = vmatprep.mubr.bf16.mxu0 %v4279_v9  ;;  %v5068_v9 = vld [vmem:[%s6491_s0 + $0x14c] ss:$72 sps:$4 sm:$0xff]  }
 0x103   : > { %3529 = vmatpush1.bf16.msra.mxu1 %v4897_v2  ;;  %v4997_v2 = vld [vmem:[%s5966_s3 + $0x220] ss:$8 sps:$4 sm:$0xff]  }
 0x104   : > { %3813 = vmatpush1.bf16.msra.mxu0 %v4900_v3  ;;  %3530 = vmatprep.subr.bf16.mxu1 %v4905_v5  ;;  %v5055_v3 = vld [vmem:[%s6491_s0 + $0x98] ss:$72 sps:$4 sm:$0xff]  }
 0x105   : > { %3814 = vmatprep.subr.bf16.mxu0 %v4908_v6  ;;  %v5000_v5 = vld [vmem:[%s5966_s3 + $0x620] ss:$8 sps:$4 sm:$0xff]   ;;  %v5005_v6 = vld [vmem:[%s5966_s3 + $0x234] ss:$8 sps:$4 sm:$0xff]  }
 0x106   : > { %3510 = vmatmul.mubr.bf16.gmra.mrb[12].mxu1 %v4270_v10  ;;  %v5003_v10 = vld [vmem:[%s5966_s3 + $0x230] ss:$8 sps:$4 sm:$0xff]  }
 0x107   : > { %3794 = vmatmul.mubr.bf16.gmra.mrb[12].mxu0 %v4278_v11  ;;  %3531 = vmatpush1.bf16.msra.mxu1 %v4903_v12  ;;  %v5006_v11 = vld [vmem:[%s5966_s3 + $0x630] ss:$8 sps:$4 sm:$0xff]   ;;  %v5011_v12 = vld [vmem:[%s5966_s3 + $0x244] ss:$8 sps:$4 sm:$0xff]  }
 0x108   : > { %3815 = vmatpush1.bf16.msra.mxu0 %v4906_v13  ;;  %3532 = vmatprep.subr.bf16.mxu1 %v4911_v14  ;;  %v5014_v13 = vld [vmem:[%s5966_s3 + $0x644] ss:$8 sps:$4 sm:$0xff]   ;;  %v5009_v14 = vld [vmem:[%s5966_s3 + $0x240] ss:$8 sps:$4 sm:$0xff]  }
 0x109   : > { %3816 = vmatprep.subr.bf16.mxu0 %v4914_v15  ;;  %3550 = vmatprep.mubr.bf16.mxu1 %v4981_v17  ;;  %v5012_v15 = vld [vmem:[%s5966_s3 + $0x640] ss:$8 sps:$4 sm:$0xff]  }
 0x10a   : > { %3834 = vmatprep.mubr.bf16.mxu0 %v4987_v21  ;;  %v5074_v17 = vld [vmem:[%s6491_s0 + $0x148] ss:$72 sps:$4 sm:$0xff]   ;;  %v5020_v21 = vld [vmem:[%s5966_s3 + $0x654] ss:$8 sps:$4 sm:$0xff]  }
 0x10b   : > { %3533 = vmatpush1.bf16.msra.mxu1 %v4909_v16  ;;  %v5073_v16 = vld [vmem:[%s6491_s0 + $0x128] ss:$72 sps:$4 sm:$0xff]  }
 0x10c   : > { %3817 = vmatpush1.bf16.msra.mxu0 %v4912_v18  ;;  %3534 = vmatprep.subr.bf16.mxu1 %v4917_v19  ;;  %v1378_v18 = vld [vmem:[%s6491_s0 + $0x1b8] sm:$0x11] }
 0x10d   : > { %3818 = vmatprep.subr.bf16.mxu0 %v4920_v20  ;;  %v1382_v19 = vld [vmem:[%s6491_s0 + $0x1d8] sm:$0x11] }
 0x10e   : > { %v5017_v20 = vld [vmem:[%s5966_s3 + $0x254] ss:$8 sps:$4 sm:$0xff]  }
 0x10f   : > { %3535 = vmatpush1.bf16.msra.mxu1 %v4915_v22  ;;  %v4273_v22 = vcombine.high %v1378_v18, %v1378_v18 }
 0x110   : > { %3819 = vmatpush1.bf16.msra.mxu0 %v4918_v23  ;;  %3536 = vmatprep.subr.bf16.mxu1 %v4923_v24  ;;  %v4281_v23 = vcombine.high %v1382_v19, %v1382_v19  ;;  %v5015_v24 = vld [vmem:[%s5966_s3 + $0x250] ss:$8 sps:$4 sm:$0xff]  }
 0x111   : > { %3820 = vmatprep.subr.bf16.mxu0 %v4926_v25  ;;  %v5018_v25 = vld [vmem:[%s5966_s3 + $0x650] ss:$8 sps:$4 sm:$0xff]  }
 0x113   : > { %3537 = vmatpush1.bf16.msra.mxu1 %v4921_v26  ;;  %v5023_v26 = vld [vmem:[%s5966_s3 + $0x264] ss:$8 sps:$4 sm:$0xff]  }
 0x114   : > { %3821 = vmatpush1.bf16.msra.mxu0 %v4924_v27  ;;  %3538 = vmatprep.subr.bf16.mxu1 %v4931_v28  ;;  %v5026_v27 = vld [vmem:[%s5966_s3 + $0x664] ss:$8 sps:$4 sm:$0xff]   ;;  %v5021_v28 = vld [vmem:[%s5966_s3 + $0x260] ss:$8 sps:$4 sm:$0xff]  }
 0x115   : > { %3822 = vmatprep.subr.bf16.mxu0 %v4936_v29  ;;  %v5024_v29 = vld [vmem:[%s5966_s3 + $0x660] ss:$8 sps:$4 sm:$0xff]  }
 0x117   : > { %3539 = vmatpush1.bf16.msra.mxu1 %v4929_v30  ;;  %v4272_v30 = vcombine.low %v1378_v18, %v1378_v18  ;;  %v5117_v18 = vld [vmem:[%s5966_s3 + $0x324] ss:$8 sps:$4 sm:$0xff]  }
 0x118   : > { %3823 = vmatpush1.bf16.msra.mxu0 %v4934_v31  ;;  %3540 = vmatprep.subr.bf16.mxu1 %v4941_v32  ;;  %v4280_v31 = vcombine.low %v1382_v19, %v1382_v19  ;;  %v5029_v32 = vld [vmem:[%s5966_s3 + $0x274] ss:$8 sps:$4 sm:$0xff]   ;;  %v5120_v19 = vld [vmem:[%s5966_s3 + $0x724] ss:$8 sps:$4 sm:$0xff]  }
 0x119   : > { %3824 = vmatprep.subr.bf16.mxu0 %v4944_v33  ;;  %v5032_v33 = vld [vmem:[%s5966_s3 + $0x674] ss:$8 sps:$4 sm:$0xff]  }
 0x11b   : > { %3541 = vmatpush1.bf16.msra.mxu1 %v4939_v34  ;;  %v5099_v34 = vld [vmem:[%s6491_s0 + $0x14] ss:$72 sps:$4 sm:$0xff]  }
 0x11c   : > { %3825 = vmatpush1.bf16.msra.mxu0 %v4942_v35  ;;  %3542 = vmatprep.subr.bf16.mxu1 %v4949_v36  ;;  %v5105_v35 = vld [vmem:[%s6491_s0 + $0x34] ss:$72 sps:$4 sm:$0xff]   ;;  %v5027_v36 = vld [vmem:[%s5966_s3 + $0x270] ss:$8 sps:$4 sm:$0xff]  }
 0x11d   : > { %3826 = vmatprep.subr.bf16.mxu0 %v4954_v37  ;;  %v5030_v37 = vld [vmem:[%s5966_s3 + $0x670] ss:$8 sps:$4 sm:$0xff]  }
 0x11f   : > { %3543 = vmatpush1.bf16.msra.mxu1 %v4947_v38  ;;  %v5035_v38 = vld [vmem:[%s5966_s3 + $0x284] ss:$8 sps:$4 sm:$0xff]  }
 0x120   : > { %3827 = vmatpush1.bf16.msra.mxu0 %v4952_v39  ;;  %3544 = vmatprep.subr.bf16.mxu1 %v4959_v40  ;;  %v5038_v39 = vld [vmem:[%s5966_s3 + $0x684] ss:$8 sps:$4 sm:$0xff]   ;;  %v5033_v40 = vld [vmem:[%s5966_s3 + $0x280] ss:$8 sps:$4 sm:$0xff]  }
 0x121   : > { %3828 = vmatprep.subr.bf16.mxu0 %v4962_v41  ;;  %v5036_v41 = vld [vmem:[%s5966_s3 + $0x680] ss:$8 sps:$4 sm:$0xff]  }
 0x123   : > { %3545 = vmatpush1.bf16.msra.mxu1 %v4957_v42  ;;  %v5041_v42 = vld [vmem:[%s5966_s3 + $0x294] ss:$8 sps:$4 sm:$0xff]  }
 0x124   : > { %3829 = vmatpush1.bf16.msra.mxu0 %v4960_v43  ;;  %3546 = vmatprep.subr.bf16.mxu1 %v4966_v44  ;;  %v5044_v43 = vld [vmem:[%s5966_s3 + $0x694] ss:$8 sps:$4 sm:$0xff]   ;;  %v5039_v44 = vld [vmem:[%s5966_s3 + $0x290] ss:$8 sps:$4 sm:$0xff]  }
 0x125   : > { %3830 = vmatprep.subr.bf16.mxu0 %v4970_v45  ;;  %v5042_v45 = vld [vmem:[%s5966_s3 + $0x690] ss:$8 sps:$4 sm:$0xff]  }
 0x127   : > { %3547 = vmatpush1.bf16.msra.mxu1 %v4964_v46  ;;  %v5049_v46 = vld [vmem:[%s5966_s3 + $0x2a4] ss:$8 sps:$4 sm:$0xff]  }
 0x128   : > { %3831 = vmatpush1.bf16.msra.mxu0 %v4968_v47  ;;  %3548 = vmatprep.subr.bf16.mxu1 %v4975_v48  ;;  %v5054_v47 = vld [vmem:[%s5966_s3 + $0x6a4] ss:$8 sps:$4 sm:$0xff]   ;;  %v5047_v48 = vld [vmem:[%s5966_s3 + $0x2a0] ss:$8 sps:$4 sm:$0xff]  }
 0x129   : > { %3832 = vmatprep.subr.bf16.mxu0 %v4978_v49  ;;  %v5052_v49 = vld [vmem:[%s5966_s3 + $0x6a0] ss:$8 sps:$4 sm:$0xff]  }
 0x12b   : > { %3549 = vmatpush1.bf16.msra.mxu1 %v4973_v50  ;;  %v5059_v50 = vld [vmem:[%s5966_s3 + $0x2b4] ss:$8 sps:$4 sm:$0xff]  }
 0x12c   : > { %3833 = vmatpush1.bf16.msra.mxu0 %v4976_v51  ;;  %3589 = vmatprep.subr.bf16.mxu1 %v4984_v53  ;;  %v5062_v51 = vld [vmem:[%s5966_s3 + $0x6b4] ss:$8 sps:$4 sm:$0xff]   ;;  %v5060_v53 = vld [vmem:[%s5966_s3 + $0x6b0] ss:$8 sps:$4 sm:$0xff]  }
 0x12d   : > { %3873 = vmatprep.subr.bf16.mxu0 %v4990_v54  ;;  %v5067_v54 = vld [vmem:[%s5966_s3 + $0x2c4] ss:$8 sps:$4 sm:$0xff]  }
 0x12e   : > { %3551 = vmatmul.mubr.bf16.vlgmr.msra.gmra.mrb[0].mxu1 %v4979_v52  ;;  %v5057_v52 = vld [vmem:[%s5966_s3 + $0x2b0] ss:$8 sps:$4 sm:$0xff]  }
 0x12f   : > { %3835 = vmatmul.mubr.bf16.vlgmr.msra.gmra.mrb[0].mxu0 %v4985_v56  ;;  %3590 = vmatpush1.bf16.msra.mxu1 %v4982_v55  ;;  %v5072_v55 = vld [vmem:[%s5966_s3 + $0x6c4] ss:$8 sps:$4 sm:$0xff]   ;;  %v5065_v56 = vld [vmem:[%s5966_s3 + $0x2c0] ss:$8 sps:$4 sm:$0xff]  }
 0x130   : > { %3874 = vmatpush1.bf16.msra.mxu0 %v4988_v57  ;;  %3591 = vmatprep.subr.bf16.mxu1 %v4993_v58  ;;  %v5070_v57 = vld [vmem:[%s5966_s3 + $0x6c0] ss:$8 sps:$4 sm:$0xff]   ;;  %v5077_v58 = vld [vmem:[%s5966_s3 + $0x2d4] ss:$8 sps:$4 sm:$0xff]  }
 0x131   : > { %3875 = vmatprep.subr.bf16.mxu0 %v4996_v59  ;;  %3560 = vmatprep.mubr.bf16.mxu1 %v5045_v60  ;;  %v5080_v59 = vld [vmem:[%s5966_s3 + $0x6d4] ss:$8 sps:$4 sm:$0xff]   ;;  %v5075_v60 = vld [vmem:[%s5966_s3 + $0x2d0] ss:$8 sps:$4 sm:$0xff]  }
 0x132   : > { %3844 = vmatprep.mubr.bf16.mxu0 %v5050_v61  ;;  %v5078_v61 = vld [vmem:[%s5966_s3 + $0x6d0] ss:$8 sps:$4 sm:$0xff]  }
 0x133   : > { %3592 = vmatpush1.bf16.msra.mxu1 %v4991_v62  ;;  %v5084_v62 = vld [vmem:[%s5966_s3 + $0x2e4] ss:$8 sps:$4 sm:$0xff]  }
 0x134   : > { %3876 = vmatpush1.bf16.msra.mxu0 %v4994_v63  ;;  %3593 = vmatprep.subr.bf16.mxu1 %v4999_v0  ;;  %v5088_v63 = vld [vmem:[%s5966_s3 + $0x6e4] ss:$8 sps:$4 sm:$0xff]   ;;  %v5082_v0 = vld [vmem:[%s5966_s3 + $0x2e0] ss:$8 sps:$4 sm:$0xff]  }
 0x135   : > { %3877 = vmatprep.subr.bf16.mxu0 %v5002_v1  ;;  %v5086_v1 = vld [vmem:[%s5966_s3 + $0x6e0] ss:$8 sps:$4 sm:$0xff]  }
 0x136   : > { %3561 = vmatmul.mubr.bf16.gmra.mrb[4].mxu1 %v5055_v3  ;;  %v5096_v3 = vld [vmem:[%s5966_s3 + $0x6f4] ss:$8 sps:$4 sm:$0xff]  }
 0x137   : > { %3845 = vmatmul.mubr.bf16.gmra.mrb[4].mxu0 %v5056_v4  ;;  %3594 = vmatpush1.bf16.msra.mxu1 %v4997_v2  ;;  %v5093_v2 = vld [vmem:[%s5966_s3 + $0x2f4] ss:$8 sps:$4 sm:$0xff]   ;;  %v5091_v4 = vld [vmem:[%s5966_s3 + $0x2f0] ss:$8 sps:$4 sm:$0xff]  }
 0x138   : > { %3878 = vmatpush1.bf16.msra.mxu0 %v5000_v5  ;;  %3595 = vmatprep.subr.bf16.mxu1 %v5005_v6  ;;  %v5094_v5 = vld [vmem:[%s5966_s3 + $0x6f0] ss:$8 sps:$4 sm:$0xff]  }
 0x139   : > { %3879 = vmatprep.subr.bf16.mxu0 %v5008_v7  ;;  %3570 = vmatprep.mubr.bf16.mxu1 %v5063_v8  ;;  %v5097_v6 = vld [vmem:[%s6491_s0 + $0x10] ss:$72 sps:$4 sm:$0xff]   ;;  %v5102_v7 = vld [vmem:[%s5966_s3 + $0x304] ss:$8 sps:$4 sm:$0xff]  }
 0x13a   : > { %3854 = vmatprep.mubr.bf16.mxu0 %v5068_v9  ;;  %v5108_v8 = vld [vmem:[%s5966_s3 + $0x704] ss:$8 sps:$4 sm:$0xff]   ;;  %v5100_v9 = vld [vmem:[%s5966_s3 + $0x300] ss:$8 sps:$4 sm:$0xff]  }
 0x13b   : > { %3596 = vmatpush1.bf16.msra.mxu1 %v5003_v10  ;;  %v5103_v10 = vld [vmem:[%s6491_s0 + $0x30] ss:$72 sps:$4 sm:$0xff]  }
 0x13c   : > { %3880 = vmatpush1.bf16.msra.mxu0 %v5006_v11  ;;  %3597 = vmatprep.subr.bf16.mxu1 %v5011_v12  ;;  %v5106_v11 = vld [vmem:[%s5966_s3 + $0x700] ss:$8 sps:$4 sm:$0xff]   ;;  %v5111_v12 = vld [vmem:[%s5966_s3 + $0x314] ss:$8 sps:$4 sm:$0xff]  }
 0x13d   : > { %3881 = vmatprep.subr.bf16.mxu0 %v5014_v13  ;;  %v5114_v13 = vld [vmem:[%s5966_s3 + $0x714] ss:$8 sps:$4 sm:$0xff]  }
 0x13e   : > { %3571 = vmatmul.mubr.bf16.gmra.mrb[8].mxu1 %v5073_v16  ;;  %v5109_v16 = vld [vmem:[%s5966_s3 + $0x310] ss:$8 sps:$4 sm:$0xff]  }
 0x13f   : > { %3855 = vmatmul.mubr.bf16.gmra.mrb[8].mxu0 %v5074_v17  ;;  %3598 = vmatpush1.bf16.msra.mxu1 %v5009_v14  ;;  %v5163_v14 = vld [vmem:[%s6491_s0 + $0xa4] ss:$72 sps:$4 sm:$0xff]   ;;  %v5112_v17 = vld [vmem:[%s5966_s3 + $0x710] ss:$8 sps:$4 sm:$0xff]  }
 0x140   : > { %3882 = vmatpush1.bf16.msra.mxu0 %v5012_v15  ;;  %3599 = vmatprep.subr.bf16.mxu1 %v5017_v20  ;;  %v5165_v15 = vld [vmem:[%s6491_s0 + $0xc4] ss:$72 sps:$4 sm:$0xff]   ;;  %v5115_v20 = vld [vmem:[%s5966_s3 + $0x320] ss:$8 sps:$4 sm:$0xff]  }
 0x141   : > { %3883 = vmatprep.subr.bf16.mxu0 %v5020_v21  ;;  %3580 = vmatprep.mubr.bf16.mxu1 %v4273_v22  ;;  %v5167_v21 = vld [vmem:[%s6491_s0 + $0xa0] ss:$72 sps:$4 sm:$0xff]  }
 0x142   : > { %3864 = vmatprep.mubr.bf16.mxu0 %v4281_v23  ;;  %v5171_v22 = vld [vmem:[%s6491_s0 + $0xc0] ss:$72 sps:$4 sm:$0xff]  }
 0x143   : > { %3600 = vmatpush1.bf16.msra.mxu1 %v5015_v24  ;;  %v5118_v23 = vld [vmem:[%s5966_s3 + $0x720] ss:$8 sps:$4 sm:$0xff]   ;;  %v5123_v24 = vld [vmem:[%s5966_s3 + $0x334] ss:$8 sps:$4 sm:$0xff]  }
 0x144   : > { %3884 = vmatpush1.bf16.msra.mxu0 %v5018_v25  ;;  %3601 = vmatprep.subr.bf16.mxu1 %v5023_v26  ;;  %v5126_v25 = vld [vmem:[%s5966_s3 + $0x734] ss:$8 sps:$4 sm:$0xff]  }
 0x145   : > { %3885 = vmatprep.subr.bf16.mxu0 %v5026_v27  ;;  %v5181_v26 = vld [vmem:[%s6491_s0 + $0x134] ss:$72 sps:$4 sm:$0xff]   ;;  %v5121_v27 = vld [vmem:[%s5966_s3 + $0x330] ss:$8 sps:$4 sm:$0xff]  }
 0x146   : > { %3581 = vmatmul.mubr.bf16.gmra.mrb[12].mxu1 %v4272_v30  ;;  %v5129_v30 = vld [vmem:[%s5966_s3 + $0x344] ss:$8 sps:$4 sm:$0xff]  }
 0x147   : > { %3865 = vmatmul.mubr.bf16.gmra.mrb[12].mxu0 %v4280_v31  ;;  %3602 = vmatpush1.bf16.msra.mxu1 %v5021_v28  ;;  %v5183_v28 = vld [vmem:[%s6491_s0 + $0x154] ss:$72 sps:$4 sm:$0xff]   ;;  %v5132_v31 = vld [vmem:[%s5966_s3 + $0x744] ss:$8 sps:$4 sm:$0xff]  }
 0x148   : > { %3886 = vmatpush1.bf16.msra.mxu0 %v5024_v29  ;;  %3603 = vmatprep.subr.bf16.mxu1 %v5029_v32  ;;  %v5124_v29 = vld [vmem:[%s5966_s3 + $0x730] ss:$8 sps:$4 sm:$0xff]  }
 0x149   : > { %3887 = vmatprep.subr.bf16.mxu0 %v5032_v33  ;;  %3621 = vmatprep.mubr.bf16.mxu1 %v5099_v34  ;;  %v5185_v32 = vld [vmem:[%s6491_s0 + $0x130] ss:$72 sps:$4 sm:$0xff]   ;;  %v1379_v34 = vld [vmem:[%s6491_s0 + $0x1c0] sm:$0x11] }
 0x14a   : > { %3905 = vmatprep.mubr.bf16.mxu0 %v5105_v35  ;;  %v5189_v33 = vld [vmem:[%s6491_s0 + $0x150] ss:$72 sps:$4 sm:$0xff]   ;;  %v1383_v35 = vld [vmem:[%s6491_s0 + $0x1e0] sm:$0x11] }
 0x14b   : > { %3604 = vmatpush1.bf16.msra.mxu1 %v5027_v36  ;;  %v5127_v36 = vld [vmem:[%s5966_s3 + $0x340] ss:$8 sps:$4 sm:$0xff]  }
 0x14c   : > { %3888 = vmatpush1.bf16.msra.mxu0 %v5030_v37  ;;  %3605 = vmatprep.subr.bf16.mxu1 %v5035_v38  ;;  %v5130_v37 = vld [vmem:[%s5966_s3 + $0x740] ss:$8 sps:$4 sm:$0xff]   ;;  %v5135_v38 = vld [vmem:[%s5966_s3 + $0x354] ss:$8 sps:$4 sm:$0xff]  }
 0x14d   : > { %3889 = vmatprep.subr.bf16.mxu0 %v5038_v39  ;;  %v5138_v39 = vld [vmem:[%s5966_s3 + $0x754] ss:$8 sps:$4 sm:$0xff]  }
 0x14f   : > { %3606 = vmatpush1.bf16.msra.mxu1 %v5033_v40  ;;  %v4275_v40 = vcombine.high %v1379_v34, %v1379_v34 }
 0x150   : > { %3890 = vmatpush1.bf16.msra.mxu0 %v5036_v41  ;;  %3607 = vmatprep.subr.bf16.mxu1 %v5041_v42  ;;  %v4283_v41 = vcombine.high %v1383_v35, %v1383_v35  ;;  %v5133_v42 = vld [vmem:[%s5966_s3 + $0x350] ss:$8 sps:$4 sm:$0xff]  }
 0x151   : > { %3891 = vmatprep.subr.bf16.mxu0 %v5044_v43  ;;  %v5136_v43 = vld [vmem:[%s5966_s3 + $0x750] ss:$8 sps:$4 sm:$0xff]  }
 0x153   : > { %3608 = vmatpush1.bf16.msra.mxu1 %v5039_v44  ;;  %v5141_v44 = vld [vmem:[%s5966_s3 + $0x364] ss:$8 sps:$4 sm:$0xff]  }
 0x154   : > { %3892 = vmatpush1.bf16.msra.mxu0 %v5042_v45  ;;  %3609 = vmatprep.subr.bf16.mxu1 %v5049_v46  ;;  %v5144_v45 = vld [vmem:[%s5966_s3 + $0x764] ss:$8 sps:$4 sm:$0xff]   ;;  %v5139_v46 = vld [vmem:[%s5966_s3 + $0x360] ss:$8 sps:$4 sm:$0xff]  }
 0x155   : > { %3893 = vmatprep.subr.bf16.mxu0 %v5054_v47  ;;  %v5142_v47 = vld [vmem:[%s5966_s3 + $0x760] ss:$8 sps:$4 sm:$0xff]  }
 0x157   : > { %3610 = vmatpush1.bf16.msra.mxu1 %v5047_v48  ;;  %v4274_v48 = vcombine.low %v1379_v34, %v1379_v34  ;;  %v5232_v34 = vld [vmem:[%s6491_s0 + $0xc8] ss:$72 sps:$4 sm:$0xff]  }
 0x158   : > { %3894 = vmatpush1.bf16.msra.mxu0 %v5052_v49  ;;  %3611 = vmatprep.subr.bf16.mxu1 %v5059_v50  ;;  %v4282_v49 = vcombine.low %v1383_v35, %v1383_v35  ;;  %v5147_v50 = vld [vmem:[%s5966_s3 + $0x374] ss:$8 sps:$4 sm:$0xff]   ;;  %v5233_v35 = vld [vmem:[%s5966_s3 + $0x820] ss:$8 sps:$4 sm:$0xff]  }
 0x159   : > { %3895 = vmatprep.subr.bf16.mxu0 %v5062_v51  ;;  %v5150_v51 = vld [vmem:[%s5966_s3 + $0x774] ss:$8 sps:$4 sm:$0xff]  }
 0x15b   : > { %3612 = vmatpush1.bf16.msra.mxu1 %v5057_v52  ;;  %v5217_v52 = vld [vmem:[%s6491_s0 + $0x1c] ss:$72 sps:$4 sm:$0xff]  }
 0x15c   : > { %3896 = vmatpush1.bf16.msra.mxu0 %v5060_v53  ;;  %3613 = vmatprep.subr.bf16.mxu1 %v5067_v54  ;;  %v5220_v53 = vld [vmem:[%s6491_s0 + $0x3c] ss:$72 sps:$4 sm:$0xff]   ;;  %v5145_v54 = vld [vmem:[%s5966_s3 + $0x370] ss:$8 sps:$4 sm:$0xff]  }
 0x15d   : > { %3897 = vmatprep.subr.bf16.mxu0 %v5072_v55  ;;  %v5148_v55 = vld [vmem:[%s5966_s3 + $0x770] ss:$8 sps:$4 sm:$0xff]  }
 0x15f   : > { %3614 = vmatpush1.bf16.msra.mxu1 %v5065_v56  ;;  %v5153_v56 = vld [vmem:[%s5966_s3 + $0x384] ss:$8 sps:$4 sm:$0xff]  }
 0x160   : > { %3898 = vmatpush1.bf16.msra.mxu0 %v5070_v57  ;;  %3615 = vmatprep.subr.bf16.mxu1 %v5077_v58  ;;  %v5156_v57 = vld [vmem:[%s5966_s3 + $0x784] ss:$8 sps:$4 sm:$0xff]   ;;  %v5151_v58 = vld [vmem:[%s5966_s3 + $0x380] ss:$8 sps:$4 sm:$0xff]  }
 0x161   : > { %3899 = vmatprep.subr.bf16.mxu0 %v5080_v59  ;;  %v5154_v59 = vld [vmem:[%s5966_s3 + $0x780] ss:$8 sps:$4 sm:$0xff]  }
 0x163   : > { %3616 = vmatpush1.bf16.msra.mxu1 %v5075_v60  ;;  %v5159_v60 = vld [vmem:[%s5966_s3 + $0x394] ss:$8 sps:$4 sm:$0xff]  }
 0x164   : > { %3900 = vmatpush1.bf16.msra.mxu0 %v5078_v61  ;;  %3617 = vmatprep.subr.bf16.mxu1 %v5084_v62  ;;  %v5162_v61 = vld [vmem:[%s5966_s3 + $0x794] ss:$8 sps:$4 sm:$0xff]   ;;  %v5157_v62 = vld [vmem:[%s5966_s3 + $0x390] ss:$8 sps:$4 sm:$0xff]  }
 0x165   : > { %3901 = vmatprep.subr.bf16.mxu0 %v5088_v63  ;;  %v5160_v63 = vld [vmem:[%s5966_s3 + $0x790] ss:$8 sps:$4 sm:$0xff]  }
 0x167   : > { %3618 = vmatpush1.bf16.msra.mxu1 %v5082_v0  ;;  %v5170_v0 = vld [vmem:[%s5966_s3 + $0x3a4] ss:$8 sps:$4 sm:$0xff]  }
 0x168   : > { %3902 = vmatpush1.bf16.msra.mxu0 %v5086_v1  ;;  %3619 = vmatprep.subr.bf16.mxu1 %v5093_v2  ;;  %v5174_v1 = vld [vmem:[%s5966_s3 + $0x7a4] ss:$8 sps:$4 sm:$0xff]   ;;  %v5168_v2 = vld [vmem:[%s5966_s3 + $0x3a0] ss:$8 sps:$4 sm:$0xff]  }
 0x169   : > { %3903 = vmatprep.subr.bf16.mxu0 %v5096_v3  ;;  %v5172_v3 = vld [vmem:[%s5966_s3 + $0x7a0] ss:$8 sps:$4 sm:$0xff]  }
 0x16b   : > { %3620 = vmatpush1.bf16.msra.mxu1 %v5091_v4  ;;  %v5177_v4 = vld [vmem:[%s5966_s3 + $0x3b4] ss:$8 sps:$4 sm:$0xff]  }
 0x16c   : > { %3904 = vmatpush1.bf16.msra.mxu0 %v5094_v5  ;;  %3660 = vmatprep.subr.bf16.mxu1 %v5102_v7  ;;  %v5180_v5 = vld [vmem:[%s5966_s3 + $0x7b4] ss:$8 sps:$4 sm:$0xff]   ;;  %v5178_v7 = vld [vmem:[%s5966_s3 + $0x7b0] ss:$8 sps:$4 sm:$0xff]  }
 0x16d   : > { %3944 = vmatprep.subr.bf16.mxu0 %v5108_v8  ;;  %v5188_v8 = vld [vmem:[%s5966_s3 + $0x3c4] ss:$8 sps:$4 sm:$0xff]  }
 0x16e   : > { %3622 = vmatmul.mubr.bf16.vlgmr.msra.gmra.mrb[0].mxu1 %v5097_v6  ;;  %v5175_v6 = vld [vmem:[%s5966_s3 + $0x3b0] ss:$8 sps:$4 sm:$0xff]  }
 0x16f   : > { %3906 = vmatmul.mubr.bf16.vlgmr.msra.gmra.mrb[0].mxu0 %v5103_v10  ;;  %3661 = vmatpush1.bf16.msra.mxu1 %v5100_v9  ;;  %v5192_v9 = vld [vmem:[%s5966_s3 + $0x7c4] ss:$8 sps:$4 sm:$0xff]   ;;  %v5186_v10 = vld [vmem:[%s5966_s3 + $0x3c0] ss:$8 sps:$4 sm:$0xff]  }
 0x170   : > { %3945 = vmatpush1.bf16.msra.mxu0 %v5106_v11  ;;  %3662 = vmatprep.subr.bf16.mxu1 %v5111_v12  ;;  %v5190_v11 = vld [vmem:[%s5966_s3 + $0x7c0] ss:$8 sps:$4 sm:$0xff]   ;;  %v5195_v12 = vld [vmem:[%s5966_s3 + $0x3d4] ss:$8 sps:$4 sm:$0xff]  }
 0x171   : > { %3946 = vmatprep.subr.bf16.mxu0 %v5114_v13  ;;  %3631 = vmatprep.mubr.bf16.mxu1 %v5163_v14  ;;  %v5198_v13 = vld [vmem:[%s5966_s3 + $0x7d4] ss:$8 sps:$4 sm:$0xff]   ;;  %v5193_v14 = vld [vmem:[%s5966_s3 + $0x3d0] ss:$8 sps:$4 sm:$0xff]  }
 0x172   : > { %3915 = vmatprep.mubr.bf16.mxu0 %v5165_v15  ;;  %v5196_v15 = vld [vmem:[%s5966_s3 + $0x7d0] ss:$8 sps:$4 sm:$0xff]  }
 0x173   : > { %3663 = vmatpush1.bf16.msra.mxu1 %v5109_v16  ;;  %v5204_v16 = vld [vmem:[%s5966_s3 + $0x3e4] ss:$8 sps:$4 sm:$0xff]  }
 0x174   : > { %3947 = vmatpush1.bf16.msra.mxu0 %v5112_v17  ;;  %3664 = vmatprep.subr.bf16.mxu1 %v5117_v18  ;;  %v5208_v17 = vld [vmem:[%s5966_s3 + $0x7e4] ss:$8 sps:$4 sm:$0xff]   ;;  %v5202_v18 = vld [vmem:[%s5966_s3 + $0x3e0] ss:$8 sps:$4 sm:$0xff]  }
 0x175   : > { %3948 = vmatprep.subr.bf16.mxu0 %v5120_v19  ;;  %v5206_v19 = vld [vmem:[%s5966_s3 + $0x7e0] ss:$8 sps:$4 sm:$0xff]  }
 0x176   : > { %3632 = vmatmul.mubr.bf16.gmra.mrb[4].mxu1 %v5167_v21  ;;  %v5214_v21 = vld [vmem:[%s5966_s3 + $0x7f4] ss:$8 sps:$4 sm:$0xff]  }
 0x177   : > { %3916 = vmatmul.mubr.bf16.gmra.mrb[4].mxu0 %v5171_v22  ;;  %3665 = vmatpush1.bf16.msra.mxu1 %v5115_v20  ;;  %v5211_v20 = vld [vmem:[%s5966_s3 + $0x3f4] ss:$8 sps:$4 sm:$0xff]   ;;  %v5209_v22 = vld [vmem:[%s5966_s3 + $0x3f0] ss:$8 sps:$4 sm:$0xff]  }
 0x178   : > { %3949 = vmatpush1.bf16.msra.mxu0 %v5118_v23  ;;  %3666 = vmatprep.subr.bf16.mxu1 %v5123_v24  ;;  %v5212_v23 = vld [vmem:[%s5966_s3 + $0x7f0] ss:$8 sps:$4 sm:$0xff]   ;;  %v5223_v24 = vld [vmem:[%s5966_s3 + $0x804] ss:$8 sps:$4 sm:$0xff]  }
 0x179   : > { %3950 = vmatprep.subr.bf16.mxu0 %v5126_v25  ;;  %3641 = vmatprep.mubr.bf16.mxu1 %v5181_v26  ;;  %v5215_v25 = vld [vmem:[%s6491_s0 + $0x18] ss:$72 sps:$4 sm:$0xff]  }
 0x17a   : > { %3925 = vmatprep.mubr.bf16.mxu0 %v5183_v28  ;;  %v5218_v26 = vld [vmem:[%s6491_s0 + $0x38] ss:$72 sps:$4 sm:$0xff]   ;;  %v5226_v28 = vld [vmem:[%s5966_s3 + $0x814] ss:$8 sps:$4 sm:$0xff]  }
 0x17b   : > { %3667 = vmatpush1.bf16.msra.mxu1 %v5121_v27  ;;  %v5221_v27 = vld [vmem:[%s5966_s3 + $0x800] ss:$8 sps:$4 sm:$0xff]  }
 0x17c   : > { %3951 = vmatpush1.bf16.msra.mxu0 %v5124_v29  ;;  %3668 = vmatprep.subr.bf16.mxu1 %v5129_v30  ;;  %v5227_v29 = vld [vmem:[%s6491_s0 + $0xac] ss:$72 sps:$4 sm:$0xff]  }
 0x17d   : > { %3952 = vmatprep.subr.bf16.mxu0 %v5132_v31  ;;  %v5229_v30 = vld [vmem:[%s6491_s0 + $0xcc] ss:$72 sps:$4 sm:$0xff]   ;;  %v5224_v31 = vld [vmem:[%s5966_s3 + $0x810] ss:$8 sps:$4 sm:$0xff]  }
 0x17e   : > { %3642 = vmatmul.mubr.bf16.gmra.mrb[8].mxu1 %v5185_v32  ;;  %v5235_v32 = vld [vmem:[%s5966_s3 + $0x824] ss:$8 sps:$4 sm:$0xff]  }
 0x17f   : > { %3926 = vmatmul.mubr.bf16.gmra.mrb[8].mxu0 %v5189_v33  ;;  %3669 = vmatpush1.bf16.msra.mxu1 %v5127_v36  ;;  %v5231_v33 = vld [vmem:[%s6491_s0 + $0xa8] ss:$72 sps:$4 sm:$0xff]   ;;  %v5238_v36 = vld [vmem:[%s5966_s3 + $0x834] ss:$8 sps:$4 sm:$0xff]  }
 0x180   : > { %3953 = vmatpush1.bf16.msra.mxu0 %v5130_v37  ;;  %3670 = vmatprep.subr.bf16.mxu1 %v5135_v38  ;;  %v5239_v37 = vld [vmem:[%s6491_s0 + $0x13c] ss:$72 sps:$4 sm:$0xff]  }
 0x181   : > { %3954 = vmatprep.subr.bf16.mxu0 %v5138_v39  ;;  %3651 = vmatprep.mubr.bf16.mxu1 %v4275_v40  ;;  %v5241_v38 = vld [vmem:[%s6491_s0 + $0x15c] ss:$72 sps:$4 sm:$0xff]   ;;  %v5236_v39 = vld [vmem:[%s5966_s3 + $0x830] ss:$8 sps:$4 sm:$0xff]  }
 0x182   : > { %3935 = vmatprep.mubr.bf16.mxu0 %v4283_v41  ;;  %v5247_v40 = vld [vmem:[%s5966_s3 + $0x844] ss:$8 sps:$4 sm:$0xff]   ;;  %v5243_v41 = vld [vmem:[%s6491_s0 + $0x138] ss:$72 sps:$4 sm:$0xff]  }
 0x183   : > { %3671 = vmatpush1.bf16.msra.mxu1 %v5133_v42  ;;  %v5244_v42 = vld [vmem:[%s6491_s0 + $0x158] ss:$72 sps:$4 sm:$0xff]  }
 0x184   : > { %3955 = vmatpush1.bf16.msra.mxu0 %v5136_v43  ;;  %3672 = vmatprep.subr.bf16.mxu1 %v5141_v44  ;;  %v1380_v43 = vld [vmem:[%s6491_s0 + $0x1c8] sm:$0x11] }
 0x185   : > { %3956 = vmatprep.subr.bf16.mxu0 %v5144_v45  ;;  %v1384_v44 = vld [vmem:[%s6491_s0 + $0x1e8] sm:$0x11] }
 0x186   : > { %3652 = vmatmul.mubr.bf16.gmra.mrb[12].mxu1 %v4274_v48  ;;  %v5245_v45 = vld [vmem:[%s5966_s3 + $0x840] ss:$8 sps:$4 sm:$0xff]   ;;  %v4285_v48 = vcombine.high %v1384_v44, %v1384_v44 }
 0x187   : > { %3936 = vmatmul.mubr.bf16.gmra.mrb[12].mxu0 %v4282_v49  ;;  %3673 = vmatpush1.bf16.msra.mxu1 %v5139_v46  ;;  %v5250_v46 = vld [vmem:[%s5966_s3 + $0x854] ss:$8 sps:$4 sm:$0xff]   ;;  %v5248_v49 = vld [vmem:[%s5966_s3 + $0x850] ss:$8 sps:$4 sm:$0xff]  }
 0x188   : > { %3957 = vmatpush1.bf16.msra.mxu0 %v5142_v47  ;;  %3674 = vmatprep.subr.bf16.mxu1 %v5147_v50  ;;  %v4277_v47 = vcombine.high %v1380_v43, %v1380_v43  ;;  %v5257_v50 = vld [vmem:[%s5966_s3 + $0x864] ss:$8 sps:$4 sm:$0xff]  }
 0x189   : > { %3958 = vmatprep.subr.bf16.mxu0 %v5150_v51  ;;  %3692 = vmatprep.mubr.bf16.mxu1 %v5217_v52  ;;  %v4276_v51 = vcombine.low %v1380_v43, %v1380_v43  ;;  %v4284_v52 = vcombine.low %v1384_v44, %v1384_v44 }
 0x18a   : > { %3976 = vmatprep.mubr.bf16.mxu0 %v5220_v53  ;;  %v5255_v53 = vld [vmem:[%s5966_s3 + $0x860] ss:$8 sps:$4 sm:$0xff]  }
 0x18b   : > { %3675 = vmatpush1.bf16.msra.mxu1 %v5145_v54  ;;  %v5260_v54 = vld [vmem:[%s5966_s3 + $0x874] ss:$8 sps:$4 sm:$0xff]  }
 0x18c   : > { %3959 = vmatpush1.bf16.msra.mxu0 %v5148_v55  ;;  %3676 = vmatprep.subr.bf16.mxu1 %v5153_v56  ;;  %v5287_v55 = vld [vmem:[%s6491_s0 + $0x44] ss:$72 sps:$4 sm:$0xff]  }
 0x18d   : > { %3960 = vmatprep.subr.bf16.mxu0 %v5156_v57  ;;  %v5290_v56 = vld [vmem:[%s6491_s0 + $0x164] ss:$72 sps:$4 sm:$0xff]   ;;  %v5258_v57 = vld [vmem:[%s5966_s3 + $0x870] ss:$8 sps:$4 sm:$0xff]  }
 0x18f   : > { %3677 = vmatpush1.bf16.msra.mxu1 %v5151_v58  ;;  %v5263_v58 = vld [vmem:[%s5966_s3 + $0x884] ss:$8 sps:$4 sm:$0xff]  }
 0x190   : > { %3961 = vmatpush1.bf16.msra.mxu0 %v5154_v59  ;;  %3678 = vmatprep.subr.bf16.mxu1 %v5159_v60  ;;  %v5261_v59 = vld [vmem:[%s5966_s3 + $0x880] ss:$8 sps:$4 sm:$0xff]   ;;  %v5266_v60 = vld [vmem:[%s5966_s3 + $0x894] ss:$8 sps:$4 sm:$0xff]  }
 0x191   : > { %3962 = vmatprep.subr.bf16.mxu0 %v5162_v61  ;;  %v5264_v61 = vld [vmem:[%s5966_s3 + $0x890] ss:$8 sps:$4 sm:$0xff]  }
 0x193   : > { %3679 = vmatpush1.bf16.msra.mxu1 %v5157_v62  ;;  %v5269_v62 = vld [vmem:[%s5966_s3 + $0x8a4] ss:$8 sps:$4 sm:$0xff]  }
 0x194   : > { %3963 = vmatpush1.bf16.msra.mxu0 %v5160_v63  ;;  %3680 = vmatprep.subr.bf16.mxu1 %v5170_v0  ;;  %v5267_v63 = vld [vmem:[%s5966_s3 + $0x8a0] ss:$8 sps:$4 sm:$0xff]   ;;  %v5272_v0 = vld [vmem:[%s5966_s3 + $0x8b4] ss:$8 sps:$4 sm:$0xff]  }
 0x195   : > { %3964 = vmatprep.subr.bf16.mxu0 %v5174_v1  ;;  %v5270_v1 = vld [vmem:[%s5966_s3 + $0x8b0] ss:$8 sps:$4 sm:$0xff]  }
 0x197   : > { %3681 = vmatpush1.bf16.msra.mxu1 %v5168_v2  ;;  %v5275_v2 = vld [vmem:[%s5966_s3 + $0x8c4] ss:$8 sps:$4 sm:$0xff]  }
 0x198   : > { %3965 = vmatpush1.bf16.msra.mxu0 %v5172_v3  ;;  %3682 = vmatprep.subr.bf16.mxu1 %v5177_v4  ;;  %v5273_v3 = vld [vmem:[%s5966_s3 + $0x8c0] ss:$8 sps:$4 sm:$0xff]   ;;  %v5278_v4 = vld [vmem:[%s5966_s3 + $0x8d4] ss:$8 sps:$4 sm:$0xff]  }
 0x199   : > { %3966 = vmatprep.subr.bf16.mxu0 %v5180_v5  ;;  %v5276_v5 = vld [vmem:[%s5966_s3 + $0x8d0] ss:$8 sps:$4 sm:$0xff]  }
 0x19b   : > { %3683 = vmatpush1.bf16.msra.mxu1 %v5175_v6  ;;  %v5281_v6 = vld [vmem:[%s5966_s3 + $0x8e4] ss:$8 sps:$4 sm:$0xff]  }
 0x19c   : > { %3967 = vmatpush1.bf16.msra.mxu0 %v5178_v7  ;;  %3684 = vmatprep.subr.bf16.mxu1 %v5188_v8  ;;  %v5279_v7 = vld [vmem:[%s5966_s3 + $0x8e0] ss:$8 sps:$4 sm:$0xff]   ;;  %v5284_v8 = vld [vmem:[%s5966_s3 + $0x8f4] ss:$8 sps:$4 sm:$0xff]  }
 0x19d   : > { %3968 = vmatprep.subr.bf16.mxu0 %v5192_v9  ;;  %v5282_v9 = vld [vmem:[%s5966_s3 + $0x8f0] ss:$8 sps:$4 sm:$0xff]  }
 0x19f   : > { %3685 = vmatpush1.bf16.msra.mxu1 %v5186_v10  ;;  %v1385_v10 = vld [vmem:[%s6491_s0 + $0x1f0] sm:$0x11] }
 0x1a0   : > { %3969 = vmatpush1.bf16.msra.mxu0 %v5190_v11  ;;  %3686 = vmatprep.subr.bf16.mxu1 %v5195_v12  ;;  %v5285_v11 = vld [vmem:[%s6491_s0 + $0x40] ss:$72 sps:$4 sm:$0xff]  }
 0x1a1   : > { %3970 = vmatprep.subr.bf16.mxu0 %v5198_v13  ;;  %v5288_v12 = vld [vmem:[%s6491_s0 + $0x160] ss:$72 sps:$4 sm:$0xff]   ;;  %v5291_v13 = vld [vmem:[%s6491_s0 + $0xd4] ss:$72 sps:$4 sm:$0xff]  }
 0x1a3   : > { %3687 = vmatpush1.bf16.msra.mxu1 %v5193_v14  ;;  %v4287_v14 = vcombine.high %v1385_v10, %v1385_v10 }
 0x1a4   : > { %3971 = vmatpush1.bf16.msra.mxu0 %v5196_v15  ;;  %3688 = vmatprep.subr.bf16.mxu1 %v5204_v16  ;;  %v5294_v15 = vld [vmem:[%s6491_s0 + $0xd0] ss:$72 sps:$4 sm:$0xff]   ;;  %v4286_v16 = vcombine.low %v1385_v10, %v1385_v10 }
 0x1a5   : > { %3972 = vmatprep.subr.bf16.mxu0 %v5208_v17 }
 0x1a7   : > { %3689 = vmatpush1.bf16.msra.mxu1 %v5202_v18 }
 0x1a8   : > { %3973 = vmatpush1.bf16.msra.mxu0 %v5206_v19  ;;  %3690 = vmatprep.subr.bf16.mxu1 %v5211_v20 }
 0x1a9   : > { %3974 = vmatprep.subr.bf16.mxu0 %v5214_v21 }
 0x1ab   : > { %3691 = vmatpush1.bf16.msra.mxu1 %v5209_v22 }
 0x1ac   : > { %3975 = vmatpush1.bf16.msra.mxu0 %v5212_v23  ;;  %4582 = vmatprep.subr.bf16.mxu1 %v5223_v24 }
 0x1ad   : > { %4015 = vmatprep.subr.bf16.mxu0 %v5223_v24 }
 0x1ae   : > { %3693 = vmatmul.mubr.bf16.vlgmr.msra.gmra.mrb[0].mxu1 %v5215_v25 }
 0x1af   : > { %3977 = vmatmul.mubr.bf16.vlgmr.msra.gmra.mrb[0].mxu0 %v5218_v26  ;;  %4598 = vmatpush1.bf16.msra.mxu1 %v5221_v27 }
 0x1b0   : > { %4016 = vmatpush1.bf16.msra.mxu0 %v5221_v27  ;;  %4583 = vmatprep.subr.bf16.mxu1 %v5226_v28 }
 0x1b1   : > { %4017 = vmatprep.subr.bf16.mxu0 %v5226_v28  ;;  %3702 = vmatprep.mubr.bf16.mxu1 %v5227_v29 }
 0x1b2   : > { %3986 = vmatprep.mubr.bf16.mxu0 %v5229_v30 }
 0x1b3   : > { %4599 = vmatpush1.bf16.msra.mxu1 %v5224_v31 }
 0x1b4   : > { %4018 = vmatpush1.bf16.msra.mxu0 %v5224_v31  ;;  %4584 = vmatprep.subr.bf16.mxu1 %v5235_v32 }
 0x1b5   : > { %4019 = vmatprep.subr.bf16.mxu0 %v5235_v32 }
 0x1b6   : > { %3703 = vmatmul.mubr.bf16.gmra.mrb[4].mxu1 %v5231_v33 }
 0x1b7   : > { %3987 = vmatmul.mubr.bf16.gmra.mrb[4].mxu0 %v5232_v34  ;;  %4600 = vmatpush1.bf16.msra.mxu1 %v5233_v35 }
 0x1b8   : > { %4020 = vmatpush1.bf16.msra.mxu0 %v5233_v35  ;;  %4585 = vmatprep.subr.bf16.mxu1 %v5238_v36 }
 0x1b9   : > { %4021 = vmatprep.subr.bf16.mxu0 %v5238_v36  ;;  %3712 = vmatprep.mubr.bf16.mxu1 %v5239_v37 }
 0x1ba   : > { %3996 = vmatprep.mubr.bf16.mxu0 %v5241_v38 }
 0x1bb   : > { %4601 = vmatpush1.bf16.msra.mxu1 %v5236_v39 }
 0x1bc   : > { %4022 = vmatpush1.bf16.msra.mxu0 %v5236_v39  ;;  %4586 = vmatprep.subr.bf16.mxu1 %v5247_v40 }
 0x1bd   : > { %4023 = vmatprep.subr.bf16.mxu0 %v5247_v40 }
 0x1be   : > { %3713 = vmatmul.mubr.bf16.gmra.mrb[8].mxu1 %v5243_v41 }
 0x1bf   : > { %3997 = vmatmul.mubr.bf16.gmra.mrb[8].mxu0 %v5244_v42  ;;  %4602 = vmatpush1.bf16.msra.mxu1 %v5245_v45 }
 0x1c0   : > { %4024 = vmatpush1.bf16.msra.mxu0 %v5245_v45  ;;  %4587 = vmatprep.subr.bf16.mxu1 %v5250_v46 }
 0x1c1   : > { %4025 = vmatprep.subr.bf16.mxu0 %v5250_v46  ;;  %3722 = vmatprep.mubr.bf16.mxu1 %v4277_v47 }
 0x1c2   : > { %4006 = vmatprep.mubr.bf16.mxu0 %v4285_v48 }
 0x1c3   : > { %4603 = vmatpush1.bf16.msra.mxu1 %v5248_v49 }
 0x1c4   : > { %4026 = vmatpush1.bf16.msra.mxu0 %v5248_v49  ;;  %4588 = vmatprep.subr.bf16.mxu1 %v5257_v50 }
 0x1c5   : > { %4027 = vmatprep.subr.bf16.mxu0 %v5257_v50 }
 0x1c6   : > { %3723 = vmatmul.mubr.bf16.gmra.mrb[12].mxu1 %v4276_v51 }
 0x1c7   : > { %4007 = vmatmul.mubr.bf16.gmra.mrb[12].mxu0 %v4284_v52  ;;  %4604 = vmatpush1.bf16.msra.mxu1 %v5255_v53 }
 0x1c8   : > { %4028 = vmatpush1.bf16.msra.mxu0 %v5255_v53  ;;  %4589 = vmatprep.subr.bf16.mxu1 %v5260_v54 }
 0x1c9   : > { %4029 = vmatprep.subr.bf16.mxu0 %v5260_v54  ;;  %4047 = vmatprep.mubr.bf16.mxu0 %v5287_v55 }
 0x1ca   : > { %4067 = vmatprep.mubr.bf16.mxu1 %v5290_v56 }
 0x1cb   : > { %4605 = vmatpush1.bf16.msra.mxu1 %v5258_v57 }
 0x1cc   : > { %4030 = vmatpush1.bf16.msra.mxu0 %v5258_v57  ;;  %4590 = vmatprep.subr.bf16.mxu1 %v5263_v58 }
 0x1cd   : > { %4031 = vmatprep.subr.bf16.mxu0 %v5263_v58 }
 0x1cf   : > { %4606 = vmatpush1.bf16.msra.mxu1 %v5261_v59 }
 0x1d0   : > { %4032 = vmatpush1.bf16.msra.mxu0 %v5261_v59  ;;  %4591 = vmatprep.subr.bf16.mxu1 %v5266_v60 }
 0x1d1   : > { %4033 = vmatprep.subr.bf16.mxu0 %v5266_v60 }
 0x1d3   : > { %4607 = vmatpush1.bf16.msra.mxu1 %v5264_v61 }
 0x1d4   : > { %4034 = vmatpush1.bf16.msra.mxu0 %v5264_v61  ;;  %4592 = vmatprep.subr.bf16.mxu1 %v5269_v62 }
 0x1d5   : > { %4035 = vmatprep.subr.bf16.mxu0 %v5269_v62 }
 0x1d7   : > { %4608 = vmatpush1.bf16.msra.mxu1 %v5267_v63 }
 0x1d8   : > { %4036 = vmatpush1.bf16.msra.mxu0 %v5267_v63  ;;  %4593 = vmatprep.subr.bf16.mxu1 %v5272_v0 }
 0x1d9   : > { %4037 = vmatprep.subr.bf16.mxu0 %v5272_v0 }
 0x1db   : > { %4609 = vmatpush1.bf16.msra.mxu1 %v5270_v1 }
 0x1dc   : > { %4038 = vmatpush1.bf16.msra.mxu0 %v5270_v1  ;;  %4594 = vmatprep.subr.bf16.mxu1 %v5275_v2 }
 0x1dd   : > { %4039 = vmatprep.subr.bf16.mxu0 %v5275_v2 }
 0x1df   : > { %4610 = vmatpush1.bf16.msra.mxu1 %v5273_v3 }
 0x1e0   : > { %4040 = vmatpush1.bf16.msra.mxu0 %v5273_v3  ;;  %4595 = vmatprep.subr.bf16.mxu1 %v5278_v4 }
 0x1e1   : > { %4041 = vmatprep.subr.bf16.mxu0 %v5278_v4 }
 0x1e3   : > { %4611 = vmatpush1.bf16.msra.mxu1 %v5276_v5 }
 0x1e4   : > { %4042 = vmatpush1.bf16.msra.mxu0 %v5276_v5  ;;  %4596 = vmatprep.subr.bf16.mxu1 %v5281_v6 }
 0x1e5   : > { %4043 = vmatprep.subr.bf16.mxu0 %v5281_v6 }
 0x1e7   : > { %4612 = vmatpush1.bf16.msra.mxu1 %v5279_v7 }
 0x1e8   : > { %4044 = vmatpush1.bf16.msra.mxu0 %v5279_v7  ;;  %4597 = vmatprep.subr.bf16.mxu1 %v5284_v8 }
 0x1e9   : > { %4045 = vmatprep.subr.bf16.mxu0 %v5284_v8 }
 0x1eb   : > { %4613 = vmatpush1.bf16.msra.mxu1 %v5282_v9 }
 0x1ec   : > { %4046 = vmatpush1.bf16.msra.mxu0 %v5282_v9 }
 0x1ee   : > { %4068 = vmatmul.mubr.bf16.vlgmr.msra.gmra.mrb[16].mxu1 %v5288_v12 }
 0x1ef   : > { %4048 = vmatmul.mubr.bf16.vlgmr.msra.gmra.mrb[0].mxu0 %v5285_v11  ;;  %4077 = vmatprep.mubr.bf16.mxu1 %v4287_v14 }
 0x1f0   : > { %4057 = vmatprep.mubr.bf16.mxu0 %v5291_v13 }
 0x1f6   : > { %4078 = vmatmul.mubr.bf16.gmra.mrb[20].mxu1 %v4286_v16 }
 0x1f7   : > { %4058 = vmatmul.mubr.bf16.gmra.mrb[4].mxu0 %v5294_v15 }
 0x281   : > { %v3694_v17 = vpop.f32.mrb[0].mxu1 }
 0x282   : > { %v3696_v18 = vpop.f32.mrb[1].mxu1 }
 0x283   : > { %v3698_v19 = vpop.f32.mrb[2].mxu1 }
 0x284   : > { %v3700_v20 = vpop.f32.mrb[3].mxu1 }
 0x289   : > { %v3704_v21 = vpop.f32.mrb[4].mxu1 }
 0x28a   : > { %v3706_v22 = vpop.f32.mrb[5].mxu1 }
 0x28b   : > { %v3708_v23 = vpop.f32.mrb[6].mxu1 }
 0x28c   : > { %v6439_v24 = vpop.f32.mrb[7].mxu1 }
 0x291   : > { %v3714_v25 = vpop.f32.mrb[8].mxu1 }
 0x292   : > { %v3998_v26 = vpop.f32.mrb[8].mxu0  ;;  %v3716_v28 = vpop.f32.mrb[9].mxu1 }
 0x293   : > { %v4622_v27 = vadd.f32 %v3998_v26, %v3714_v25  ;;  %v4000_v29 = vpop.f32.mrb[9].mxu0  ;;  %v3718_v31 = vpop.f32.mrb[10].mxu1 }
 0x294   : > { %v4624_v30 = vadd.f32 %v4000_v29, %v3716_v28  ;;  %v4002_v32 = vpop.f32.mrb[10].mxu0  ;;  %v3720_v34 = vpop.f32.mrb[11].mxu1 }
 0x295   : > { %v4626_v33 = vadd.f32 %v4002_v32, %v3718_v31  ;;  %v4004_v35 = vpop.f32.mrb[11].mxu0 }
 0x296   : > { %v4628_v36 = vadd.f32 %v4004_v35, %v3720_v34 }
 0x299   : > { %v3724_v37 = vpop.f32.mrb[12].mxu1 }
 0x29a   : > { %v4008_v38 = vpop.f32.mrb[12].mxu0  ;;  %v3726_v40 = vpop.f32.mrb[13].mxu1 }
 0x29b   : > { %v4630_v39 = vadd.f32 %v4008_v38, %v3724_v37  ;;  %v4010_v41 = vpop.f32.mrb[13].mxu0  ;;  %v3728_v43 = vpop.f32.mrb[14].mxu1 }
 0x29c   : > { %v4632_v42 = vadd.f32 %v4010_v41, %v3726_v40  ;;  %v4012_v44 = vpop.f32.mrb[14].mxu0  ;;  %v3729_v45 = vpop.f32.mrb[15].mxu1 }
 0x29d   : > { %v4013_v46 = vpop.f32.mrb[15].mxu0 }
 0x2c1   : > { %v4069_v48 = vpop.f32.mrb[16].mxu1 }
 0x2c2   : > { %v4049_v47 = vpop.f32.mrb[0].mxu0  ;;  %v4623_v50 = vadd.f32 %v4622_v27, %v4069_v48  ;;  %v4071_v52 = vpop.f32.mrb[17].mxu1 }
 0x2c3   : > { %v4614_v49 = vadd.f32 %v4049_v47, %v3694_v17  ;;  %v4051_v51 = vpop.f32.mrb[1].mxu0  ;;  %v4625_v54 = vadd.f32 %v4624_v30, %v4071_v52  ;;  %v4073_v56 = vpop.f32.mrb[18].mxu1 }
 0x2c4   : > { %v4615_v53 = vadd.f32 %v4051_v51, %v3696_v18  ;;  %v4053_v55 = vpop.f32.mrb[2].mxu0  ;;  %4094 = vst [vmem:[%s6443_s19 + $0x40] sm:$0xff] %v4623_v50  ;;  %v4627_v58 = vadd.f32 %v4626_v33, %v4073_v56  ;;  %v4075_v60 = vpop.f32.mrb[19].mxu1 }
 0x2c5   : > { %4086 = vst [vmem:[%s6443_s19] sm:$0xff] %v4614_v49  ;;  %v4616_v57 = vadd.f32 %v4053_v55, %v3698_v19  ;;  %v4055_v59 = vpop.f32.mrb[3].mxu0  ;;  %4095 = vst [vmem:[%s6443_s19 + $0x48] sm:$0xff] %v4625_v54  ;;  %v4629_v62 = vadd.f32 %v4628_v36, %v4075_v60 }
 0x2c6   : > { %4087 = vst [vmem:[%s6443_s19 + $0x8] sm:$0xff] %v4615_v53  ;;  %v4617_v61 = vadd.f32 %v4055_v59, %v3700_v20  ;;  %4096 = vst [vmem:[%s6443_s19 + $0x50] sm:$0xff] %v4627_v58 }
 0x2c7   : > { %4088 = vst [vmem:[%s6443_s19 + $0x10] sm:$0xff] %v4616_v57  ;;  %4097 = vst [vmem:[%s6443_s19 + $0x58] sm:$0xff] %v4629_v62 }
 0x2c8   : > { %4089 = vst [vmem:[%s6443_s19 + $0x18] sm:$0xff] %v4617_v61 }
 0x2c9   : > { %v4079_v0 = vpop.f32.mrb[20].mxu1 }
 0x2ca   : > { %v4059_v63 = vpop.f32.mrb[4].mxu0  ;;  %v4631_v2 = vadd.f32 %v4630_v39, %v4079_v0  ;;  %v4081_v4 = vpop.f32.mrb[21].mxu1  ;;  %4106 = sbr.rel (!%p5365_p5) target bundleno = 729 (0x2d9), region = 70 }
 0x2cb   : > { %v4618_v1 = vadd.f32 %v4059_v63, %v3704_v21  ;;  %v4061_v3 = vpop.f32.mrb[5].mxu0  ;;  %v4633_v6 = vadd.f32 %v4632_v42, %v4081_v4  ;;  %v4083_v8 = vpop.f32.mrb[22].mxu1  ;;  %v4138_v21 = vld [vmem:[%s6443_s19 + $0x40] sm:$0xff] (%p5365_p5) }
 0x2cc   : > { %v4619_v5 = vadd.f32 %v4061_v3, %v3706_v22  ;;  %v4063_v7 = vpop.f32.mrb[6].mxu0  ;;  %4098 = vst [vmem:[%s6443_s19 + $0x60] sm:$0x1] %v4631_v2  ;;  %v4084_v11 = vpop.f32.mrb[23].mxu1  ;;  %v4122_v13 = vld [vmem:[%s6443_s19] sm:$0xff] (%p5365_p5)  ;;  %4139 = vst [vmem:[%s4109_s17 + $0x80] sm:$0xff] (%p5365_p5), %v4138_v21 }
 0x2cd   : > { %4090 = vst [vmem:[%s6443_s19 + $0x20] sm:$0xff] %v4618_v1  ;;  %v4620_v9 = vadd.f32 %v4063_v7, %v3708_v23  ;;  %v4065_v10 = vpop.f32.mrb[7].mxu0  ;;  %4099 = vst [vmem:[%s6443_s19 + $0x68] sm:$0x1] %v4633_v6  ;;  %v4124_v14 = vld [vmem:[%s6443_s19 + $0x8] sm:$0xff] (%p5365_p5)  ;;  %v4142_v23 = vld [vmem:[%s6443_s19 + $0x50] sm:$0xff] (%p5365_p5) }
 0x2ce   : > { %4091 = vst [vmem:[%s6443_s19 + $0x28] sm:$0xff] %v4619_v5  ;;  %v4621_v12 = vadd.f32 %v4065_v10, %v6439_v24  ;;  %v4126_v15 = vld [vmem:[%s6443_s19 + $0x10] sm:$0xff] (%p5365_p5)  ;;  %4123 = vst [vmem:[%s4109_s17] sm:$0xff] (%p5365_p5), %v4122_v13  ;;  %v4140_v22 = vld [vmem:[%s6443_s19 + $0x48] sm:$0xff] (%p5365_p5) }
 0x2cf   : > { %4092 = vst [vmem:[%s6443_s19 + $0x30] sm:$0xff] %v4620_v9  ;;  %v4128_v16 = vld [vmem:[%s6443_s19 + $0x18] sm:$0xff] (%p5365_p5)  ;;  %4125 = vst [vmem:[%s4109_s17 + $0x8] sm:$0xff] (%p5365_p5), %v4124_v14 }
 0x2d0   : > { %4093 = vst [vmem:[%s6443_s19 + $0x38] sm:$0xff] %v4621_v12  ;;  %4127 = vst [vmem:[%s4109_s17 + $0x20] sm:$0xff] (%p5365_p5), %v4126_v15  ;;  %v4144_v24 = vld [vmem:[%s6443_s19 + $0x58] sm:$0xff] (%p5365_p5) }
 0x2d1   : > { %4129 = vst [vmem:[%s4109_s17 + $0x28] sm:$0xff] %v4128_v16  ;;  %4141 = vst [vmem:[%s4109_s17 + $0x88] sm:$0xff] %v4140_v22 }
 0x2d2   : > { %4143 = vst [vmem:[%s4109_s17 + $0xa0] sm:$0xff] %v4142_v23  ;;  %4145 = vst [vmem:[%s4109_s17 + $0xa8] sm:$0xff] %v4144_v24 }
 0x2d3   : > { %v4146_v25 = vld [vmem:[%s6443_s19 + $0x60] sm:$0xff] }
 0x2d4   : > { %v4130_v17 = vld [vmem:[%s6443_s19 + $0x20] sm:$0xff]  ;;  %v4148_v26 = vld [vmem:[%s6443_s19 + $0x68] sm:$0xff]  ;;  %4147 = vst [vmem:[%s4109_s17 + $0xc0] sm:$0xff] %v4146_v25 }
 0x2d5   : > { %v4132_v18 = vld [vmem:[%s6443_s19 + $0x28] sm:$0xff]  ;;  %4131 = vst [vmem:[%s4109_s17 + $0x40] sm:$0xff] %v4130_v17  ;;  %4149 = vst [vmem:[%s4109_s17 + $0xc8] sm:$0xff] %v4148_v26 }
 0x2d6   : > { %4133 = vst [vmem:[%s4109_s17 + $0x48] sm:$0xff] %v4132_v18  ;;  %v4134_v19 = vld [vmem:[%s6443_s19 + $0x30] sm:$0xff] }
 0x2d7   : > { %v4136_v20 = vld [vmem:[%s6443_s19 + $0x38] sm:$0xff]  ;;  %4135 = vst [vmem:[%s4109_s17 + $0x60] sm:$0xff] %v4134_v19 }
 0x2d8   : > { %4137 = vst [vmem:[%s4109_s17 + $0x68] sm:$0xff] %v4136_v20 }
 0x2d9 PF: > { %p9_p10 = scmp.ge.s32.totalorder %s5352_s13, 4   ;;  %s6495_s9 = smov %s5314_s10 }
 0x2da   : > { %s6496_s10 = smov %s5363_s16  ;;  %s6497_s11 = smov %s5352_s13 }
 0x2db   :  { %11 = sbr.rel (!%p9_p10) target bundleno = 2 (0x2), region = 124 }

</bundles_post_ra>
